<compile_context>
chip_gen: v6e
topology: v6e:2x2x1
jax: 0.10.0
libtpu: 0.0.40
codegen_flags: <defaults>
</compile_context>

<pallas_src>
import jax
import jax.numpy as jnp
from jax.experimental import pallas as pl
from jax.experimental.pallas import tpu as pltpu


_VMEM_LIMIT = 48 * 1024 * 1024   # fits v7x's 64 MiB physical VMEM with headroom


def _round_up(x, m):
    return ((x + m - 1) // m) * m


def _pad_axis0(x, n, value=0.0):
    pad = n - x.shape[0]
    if pad <= 0:
        return x
    return jnp.concatenate(
        [x, jnp.full((pad,) + x.shape[1:], value, x.dtype)], axis=0)


def _pick_tile(n, cap=512):
    for t in (cap, 256, 128, 64, 32, 16, 8):
        if t <= cap and n % t == 0:
            return t
    return None


def _const_spec(arr):
    nd = arr.ndim
    return pl.BlockSpec(arr.shape, lambda *_: (0,) * nd)


# -----------------------------------------------------------------------------
# Kernel 1: single-layer GRU recurrence (input projection hoisted outside).
#   gi_ref : (TT, Bh, 3H) bf16  precomputed x@W_ih + b_ih for this time block
#   len_ref: (Bh, 1)      int32 sequence lengths (resident block)
#   Emits the *shifted* hidden sequence out[t] = h_{t} (pre-update state,
#   zeroed at padding), matching cat([0, padded_output[:-1]]), stored bf16.
# -----------------------------------------------------------------------------
def _gru_kernel(len_ref, gi_ref, whh_ref, bhh_ref, out_ref, last_ref, h_scr):
    t_blk = pl.program_id(1)
    TT = gi_ref.shape[0]
    H = h_scr.shape[1]

    @pl.when(t_blk == 0)
    def _():
        h_scr[...] = jnp.zeros_like(h_scr)

    lens = len_ref[...]                     # (Bh, 1) int32
    whh = whh_ref[...]                      # (H, 3H) bf16
    bhh = bhh_ref[...]                      # (1, 3H) f32

    h = h_scr[...]                          # (Bh, H) f32 carried state
    # Statically unrolled inner time loop (TT small & static).
    # TODO(synk): for much larger TT, switch to a partially unrolled
    #             lax.fori_loop to bound vreg live ranges.
    for tt in range(TT):
        t_idx = t_blk * TT + tt
        valid = (t_idx < lens).astype(jnp.float32)         # (Bh,1): t   < L
        prev_valid = (t_idx <= lens).astype(jnp.float32)   # (Bh,1): t-1 < L

        # shifted output: pre-update state, zero where previous step was pad
        out_ref[tt] = (prev_valid * h).astype(jnp.bfloat16)

        gi_t = gi_ref[tt].astype(jnp.float32)              # (Bh, 3H)
        gh = jnp.dot(h.astype(jnp.bfloat16), whh,
                     preferred_element_type=jnp.float32) + bhh

        # PyTorch gate ordering: r, z, n   (gate math kept in f32)
        r = jax.nn.sigmoid(gi_t[:, 0 * H:1 * H] + gh[:, 0 * H:1 * H])
        z = jax.nn.sigmoid(gi_t[:, 1 * H:2 * H] + gh[:, 1 * H:2 * H])
        n = jnp.tanh(gi_t[:, 2 * H:3 * H] + r * gh[:, 2 * H:3 * H])
        h_cand = (1.0 - z) * n + z * h
        h = valid * h_cand + (1.0 - valid) * h             # packed-seq semantics

    h_scr[...] = h

    @pl.when(t_blk == pl.num_programs(1) - 1)
    def _():
        last_ref[...] = h      # state at each sequence's last valid step


def gru_forward(gi, lens_col, w_hh_bf16, b_hh, hidden_dim, tt_block):
    T_pad, B, G = gi.shape
    H = hidden_dim
    TT = tt_block
    assert T_pad % TT == 0
    # v7x megacore: split the batch over the leading ("parallel") grid axis
    # when each half stays sublane-aligned; no-op on 1-TC chips / tiny batches.
    n_bsplit = 2 if (B % 16 == 0) else 1
    Bh = B // n_bsplit

    grid_spec = pltpu.PrefetchScalarGridSpec(
        num_scalar_prefetch=0,
        grid=(n_bsplit, T_pad // TT),
        in_specs=[
            pl.BlockSpec((Bh, 1), lambda b, t: (b, 0)),        # lengths, resident
            pl.BlockSpec((TT, Bh, G), lambda b, t: (t, b, 0)),
            pl.BlockSpec((H, G), lambda b, t: (0, 0)),
            pl.BlockSpec((1, G), lambda b, t: (0, 0)),
        ],
        out_specs=[
            pl.BlockSpec((TT, Bh, H), lambda b, t: (t, b, 0)),
            pl.BlockSpec((Bh, H), lambda b, t: (b, 0)),
        ],
        scratch_shapes=[pltpu.VMEM((Bh, H), jnp.float32)],
    )
    hidden, last = pl.pallas_call(
        _gru_kernel,
        out_shape=(jax.ShapeDtypeStruct((T_pad, B, H), jnp.bfloat16),
                   jax.ShapeDtypeStruct((B, H), jnp.float32)),
        grid_spec=grid_spec,
        compiler_params=pltpu.CompilerParams(
            dimension_semantics=("parallel", "arbitrary"),
            vmem_limit_bytes=_VMEM_LIMIT),
    )(lens_col, gi, w_hh_bf16, b_hh)
    return hidden, last


# -----------------------------------------------------------------------------
# Kernel 2: fused shared+company/title heads + both NCE losses, tiled over
# N = T*B rows.  Each tile emits a lane-aligned partial-loss block; the grid
# axis is "parallel" (megacore-friendly) and partials are summed in XLA.
# -----------------------------------------------------------------------------
def _heads_nce_kernel(h_ref, w1_ref, b1_ref,
                      wc1_ref, bc1_ref, wc2_ref, bc2_ref,
                      wt1_ref, bt1_ref, wt2_ref, bt2_ref,
                      cemb_ref, cqt_ref, cmask_ref,
                      temb_ref, tqt_ref, tmask_ref,
                      closs_ref, tloss_ref):
    hb = h_ref[...]                                            # (TN, H) bf16
    shared = jnp.maximum(
        jnp.dot(hb, w1_ref[...], preferred_element_type=jnp.float32)
        + b1_ref[...], 0.0)
    sb = shared.astype(jnp.bfloat16)

    c1 = jnp.maximum(
        jnp.dot(sb, wc1_ref[...], preferred_element_type=jnp.float32)
        + bc1_ref[...], 0.0)
    comp_pred = (jnp.dot(c1.astype(jnp.bfloat16), wc2_ref[...],
                         preferred_element_type=jnp.float32) + bc2_ref[...])

    t1 = jnp.maximum(
        jnp.dot(sb, wt1_ref[...], preferred_element_type=jnp.float32)
        + bt1_ref[...], 0.0)
    title_pred = (jnp.dot(t1.astype(jnp.bfloat16), wt2_ref[...],
                          preferred_element_type=jnp.float32) + bt2_ref[...])

    def nce_partial(pred, emb_ref, qt_ref, mask_ref):
        emb = emb_ref[...].astype(jnp.float32)       # (TN, K1, D)
        qt = qt_ref[...]                             # (TN, K1)
        mask = mask_ref[...]                         # (TN, 1)
        # per-row dot with candidates (bounded (TN,K1,D) temporary)
        logits = jnp.sum(pred[:, None, :] * emb, axis=-1)        # (TN, K1)
        safe_qt = jnp.where(qt > 0.0, qt, 1.0)       # guard log(0) -> inf*0=NaN
        logits = logits - jnp.log(safe_qt)
        targets = (jax.lax.broadcasted_iota(jnp.int32, logits.shape, 1) == 0
                   ).astype(jnp.float32)
        bce = (jnp.maximum(logits, 0.0) - logits * targets
               + jnp.log1p(jnp.exp(-jnp.abs(logits))))
        per_row = jnp.sum(bce, axis=-1, keepdims=True) * mask
        return jnp.sum(per_row)

    cval = nce_partial(comp_pred, cemb_ref, cqt_ref, cmask_ref)
    tval = nce_partial(title_pred, temb_ref, tqt_ref, tmask_ref)
    # Per-tile partial losses (no carried accumulator -> parallel grid axis).
    closs_ref[...] = jnp.full(closs_ref.shape, cval, jnp.float32)
    tloss_ref[...] = jnp.full(tloss_ref.shape, tval, jnp.float32)


def heads_nce_loss(h_flat, p, cemb, cqt, cmask, temb, tqt, tmask):
    N = cemb.shape[0]            # valid rows (T*B); h_flat may have more rows
    H = h_flat.shape[1]
    TN = _pick_tile(N)
    if TN is None:
        # Rare fallback: pad the streamed row tensors once to a tile multiple.
        TN = min(512, _round_up(min(N, 512), 8))
        N_pad = _round_up(N, TN)
        cemb = _pad_axis0(cemb, N_pad)
        cqt = _pad_axis0(cqt, N_pad, 1.0)
        cmask = _pad_axis0(cmask, N_pad)
        temb = _pad_axis0(temb, N_pad)
        tqt = _pad_axis0(tqt, N_pad, 1.0)
        tmask = _pad_axis0(tmask, N_pad)
        if h_flat.shape[0] < N_pad:
            h_flat = _pad_axis0(h_flat, N_pad)
    else:
        N_pad = N
    G = N_pad // TN

    K1c, dc = cemb.shape[1], cemb.shape[2]
    K1t, do = temb.shape[1], temb.shape[2]

    grid_spec = pltpu.PrefetchScalarGridSpec(
        num_scalar_prefetch=0,
        grid=(G,),
        in_specs=[
            pl.BlockSpec((TN, H), lambda i: (i, 0)),
            _const_spec(p["w1"]), _const_spec(p["b1"]),
            _const_spec(p["wc1"]), _const_spec(p["bc1"]),
            _const_spec(p["wc2"]), _const_spec(p["bc2"]),
            _const_spec(p["wt1"]), _const_spec(p["bt1"]),
            _const_spec(p["wt2"]), _const_spec(p["bt2"]),
            pl.BlockSpec((TN, K1c, dc), lambda i: (i, 0, 0)),
            pl.BlockSpec((TN, K1c), lambda i: (i, 0)),
            pl.BlockSpec((TN, 1), lambda i: (i, 0)),
            pl.BlockSpec((TN, K1t, do), lambda i: (i, 0, 0)),
            pl.BlockSpec((TN, K1t), lambda i: (i, 0)),
            pl.BlockSpec((TN, 1), lambda i: (i, 0)),
        ],
        out_specs=[
            pl.BlockSpec((1, 8, 128), lambda i: (i, 0, 0)),
            pl.BlockSpec((1, 8, 128), lambda i: (i, 0, 0)),
        ],
    )
    c_part, t_part = pl.pallas_call(
        _heads_nce_kernel,
        out_shape=(jax.ShapeDtypeStruct((G, 8, 128), jnp.float32),
                   jax.ShapeDtypeStruct((G, 8, 128), jnp.float32)),
        grid_spec=grid_spec,
        compiler_params=pltpu.CompilerParams(
            dimension_semantics=("parallel",),
            vmem_limit_bytes=_VMEM_LIMIT),
    )(h_flat, p["w1"], p["b1"], p["wc1"], p["bc1"], p["wc2"], p["bc2"],
      p["wt1"], p["bt1"], p["wt2"], p["bt2"],
      cemb, cqt, cmask, temb, tqt, tmask)
    return jnp.sum(c_part[:, 0, 0]), jnp.sum(t_part[:, 0, 0])


# -----------------------------------------------------------------------------
# Kernel 3: skill head (Linear -> Linear) + BCEWithLogits .mean(-1).sum()
# -----------------------------------------------------------------------------
def _skill_loss_kernel(h_ref, w1_ref, b1_ref, w2_ref, b2_ref, y_ref, out_ref):
    hb = h_ref[...].astype(jnp.bfloat16)
    z1 = (jnp.dot(hb, w1_ref[...], preferred_element_type=jnp.float32)
          + b1_ref[...])
    logits = (jnp.dot(z1.astype(jnp.bfloat16), w2_ref[...],
                      preferred_element_type=jnp.float32) + b2_ref[...])
    y = y_ref[...]
    bce = (jnp.maximum(logits, 0.0) - logits * y
           + jnp.log1p(jnp.exp(-jnp.abs(logits))))
    out_ref[...] = jnp.sum(jnp.mean(bce, axis=-1)).reshape(1, 1)


def skill_loss_fn(last_states, p, labels):
    # TODO(synk): tiny (B,H)x(H,skills) problem; could also be folded into the
    #             heads kernel or left to plain XLA.
    out = pl.pallas_call(
        _skill_loss_kernel,
        out_shape=jax.ShapeDtypeStruct((1, 1), jnp.float32),
    )(last_states, p["ws1"], p["bs1"], p["wse"], p["bse"], labels)
    return out[0, 0]


# -----------------------------------------------------------------------------
# Forward pass (glue: embedding gathers, concats, scalar combination).
# -----------------------------------------------------------------------------
def baseline_forward(params, batch, negative_batch, dims, hidden_dim,
                     tt_block=16):
    (L, T, B, job_mask, edu_mask, locality, industry, times, intervals,
     schools, degrees, majors, companies, titles, skill_label) = batch
    del locality, industry   # use_loc_ind=False
    negative_companies, negative_titles, company_qt, title_qt = negative_batch

    company_mask = (companies > 0).astype(jnp.float32)
    title_mask = (titles > 0).astype(jnp.float32)
    total_time_steps = jnp.sum(job_mask)

    # bf16 embedding gathers (tables stored bf16).
    majors_e = params["majors_embed"][majors]                 # (T,B,dm)
    titles_e = params["titles_embed"][titles]                 # (T,B,do)
    neg_titles_e = params["titles_embed"][negative_titles]    # (T,B,K,do)
    all_titles_e = jnp.concatenate([titles_e[:, :, None, :], neg_titles_e], axis=2)
    companies_e = params["company_embed"][companies]
    neg_companies_e = params["company_embed"][negative_companies]
    all_companies_e = jnp.concatenate(
        [companies_e[:, :, None, :], neg_companies_e], axis=2)
    schools_e = params["school_embed"][schools]
    degrees_e = params["degree_embed"][degrees]

    times_s = (times.astype(jnp.float32)[..., None] - 180.0) / 30.0
    times_e = (times_s * params["time_w"] + params["time_b"]).astype(jnp.bfloat16)
    intervals_s = (intervals.astype(jnp.float32)[..., None] - 5.0) / 5.0
    intervals_e = (intervals_s * params["interval_w"]
                   + params["interval_b"]).astype(jnp.bfloat16)

    edu_in = (jnp.concatenate([degrees_e, schools_e, majors_e], axis=-1)
              * edu_mask[..., None].astype(jnp.bfloat16))
    job_in = (jnp.concatenate([companies_e, titles_e], axis=-1)
              * job_mask[..., None].astype(jnp.bfloat16))
    input_embeddings = jnp.concatenate(
        [edu_in, job_in, intervals_e, times_e], axis=-1)      # (T,B,Din) bf16

    # Pad time up-front so neither gi nor hidden is sliced / re-padded later.
    TT = min(tt_block, T)
    T_pad = _round_up(T, TT)
    if T_pad != T:
        input_embeddings = _pad_axis0(input_embeddings, T_pad)

    # Hoisted GRU input projection: one big bf16 MXU matmul (f32 accumulate),
    # emitted as bf16 storage (halves the GRU kernel's dominant HBM read).
    gi = (jnp.einsum("tbd,dg->tbg", input_embeddings, params["gru_w_ih"],
                     preferred_element_type=jnp.float32)
          + params["gru_b_ih"][None]).astype(jnp.bfloat16)    # (T_pad,B,3H)

    lens_col = L.astype(jnp.int32).reshape(B, 1)
    hidden_shifted, last_states = gru_forward(
        gi, lens_col, params["gru_w_hh"], params["gru_b_hh"], hidden_dim, TT)

    dc, do = dims["companies"], dims["occupations"]
    N = T * B                                                 # valid rows only
    h_flat = hidden_shifted.reshape(T_pad * B, hidden_dim)    # bf16, no slice

    company_loss, title_loss = heads_nce_loss(
        h_flat, params,
        all_companies_e.reshape(N, -1, dc),
        company_qt.reshape(N, -1),
        company_mask.reshape(N, 1),
        all_titles_e.reshape(N, -1, do),
        title_qt.reshape(N, -1),
        title_mask.reshape(N, 1))

    skill_loss = skill_loss_fn(last_states, params, skill_label)

    total_loss = (company_loss + title_loss) / total_time_steps + skill_loss / B
    return total_loss


# -----------------------------------------------------------------------------
# Deterministic parameter init (synthetic; shapes follow the module __init__).
# MXU weight matrices and embedding tables pre-cast to bf16 once; biases f32.
# -----------------------------------------------------------------------------
def init_params(key, dims, vocab, din, hidden_dim, shared_dim):
    ks = jax.random.split(key, 20)
    nrm = lambda k, s: 0.1 * jax.random.normal(k, s, dtype=jnp.float32)
    bf = lambda x: x.astype(jnp.bfloat16)
    H, S = hidden_dim, shared_dim
    p = {
        "company_embed": bf(nrm(ks[0], (vocab["companies"], dims["companies"]))),
        "school_embed":  bf(nrm(ks[1], (vocab["schools"], dims["schools"]))),
        "degree_embed":  bf(nrm(ks[2], (vocab["degrees"], dims["degrees"]))),
        "majors_embed":  bf(nrm(ks[3], (vocab["majors"], dims["majors"]))),
        "titles_embed":  bf(nrm(ks[4], (vocab["occupations"], dims["occupations"]))),
        "time_w":     nrm(ks[5], (dims["times"],)),
        "time_b":     jnp.zeros((dims["times"],), jnp.float32),
        "interval_w": nrm(ks[6], (dims["intervals"],)),
        "interval_b": jnp.zeros((dims["intervals"],), jnp.float32),
        "gru_w_ih": bf(nrm(ks[7], (din, 3 * H))),
        "gru_w_hh": bf(nrm(ks[8], (H, 3 * H))),
        "gru_b_ih": jnp.zeros((1, 3 * H), jnp.float32),
        "gru_b_hh": jnp.zeros((1, 3 * H), jnp.float32),
        "w1":  bf(nrm(ks[9], (H, S))),        "b1":  jnp.zeros((1, S), jnp.float32),
        "wc1": bf(nrm(ks[10], (S, 256))),     "bc1": jnp.zeros((1, 256), jnp.float32),
        "wc2": bf(nrm(ks[11], (256, dims["companies"]))),
        "bc2": jnp.zeros((1, dims["companies"]), jnp.float32),
        "wt1": bf(nrm(ks[12], (S, 256))),     "bt1": jnp.zeros((1, 256), jnp.float32),
        "wt2": bf(nrm(ks[13], (256, dims["occupations"]))),
        "bt2": jnp.zeros((1, dims["occupations"]), jnp.float32),
        "ws1": bf(nrm(ks[14], (H, dims["skills"]))),
        "bs1": jnp.zeros((1, dims["skills"]), jnp.float32),
        "wse": bf(nrm(ks[15], (dims["skills"], vocab["skills"]))),
        "bse": jnp.zeros((1, vocab["skills"]), jnp.float32),
    }
    return p


if __name__ == "__main__":
    # small shapes
    T, B, K = 8, 4, 3
    hidden_dim, shared_dim = 32, 32
    dims = dict(companies=16, schools=8, degrees=4, times=4, intervals=4,
                locality=4, industry=4, majors=8, occupations=16, skills=8)
    vocab = dict(companies=50, schools=30, degrees=10, majors=20,
                 occupations=40, skills=25)
    # total_input_dimension = sum(dims) - (industry+locality) - skills
    din = sum(dims.values()) - (dims["industry"] + dims["locality"]) - dims["skills"]

    key = jax.random.PRNGKey(0)
    pkey, dkey = jax.random.split(key)
    params = init_params(pkey, dims, vocab, din, hidden_dim, shared_dim)

    dk = jax.random.split(dkey, 16)
    L = jnp.concatenate(
        [jnp.array([T], jnp.int32),
         jax.random.randint(dk[0], (B - 1,), 1, T + 1).astype(jnp.int32)])
    valid_tb = (jnp.arange(T)[:, None] < L[None, :]).astype(jnp.float32)   # (T,B)
    job_mask = valid_tb
    edu_mask = (jnp.arange(T)[:, None] == 0).astype(jnp.float32) * jnp.ones((1, B))

    def rint(k, shape, hi):
        return jax.random.randint(k, shape, 1, hi).astype(jnp.int32)

    mask_i = valid_tb.astype(jnp.int32)
    schools = rint(dk[1], (T, B), vocab["schools"]) * mask_i
    degrees = rint(dk[2], (T, B), vocab["degrees"]) * mask_i
    majors = rint(dk[3], (T, B), vocab["majors"]) * mask_i
    companies = rint(dk[4], (T, B), vocab["companies"]) * mask_i
    titles = rint(dk[5], (T, B), vocab["occupations"]) * mask_i
    times = jax.random.uniform(dk[6], (T, B), jnp.float32, 120.0, 240.0)
    intervals = jax.random.uniform(dk[7], (T, B), jnp.float32, 0.0, 10.0)
    skill_label = (jax.random.uniform(dk[8], (B, vocab["skills"])) > 0.8
                   ).astype(jnp.float32)
    locality = rint(dk[9], (B,), 10)
    industry = rint(dk[10], (B,), 10)

    negative_companies = rint(dk[11], (T, B, K), vocab["companies"])
    negative_titles = rint(dk[12], (T, B, K), vocab["occupations"])
    company_qt = jax.random.uniform(dk[13], (T, B, K + 1), jnp.float32, 0.05, 1.0)
    title_qt = jax.random.uniform(dk[14], (T, B, K + 1), jnp.float32, 0.05, 1.0)

    batch = (L, T, B, job_mask, edu_mask, locality, industry, times, intervals,
             schools, degrees, majors, companies, titles, skill_label)
    negative_batch = (negative_companies, negative_titles, company_qt, title_qt)

    loss = baseline_forward(params, batch, negative_batch, dims, hidden_dim)
    loss = jax.block_until_ready(loss)
    assert jnp.isfinite(loss)
    print("KERNEL_OK")
</pallas_src>

<mosaic_0001>
module attributes {stable_mosaic.version = 11 : i64} {
  func.func @_gru_kernel(%arg0: i32, %arg1: i32, %arg2: memref<4x1xi32, #tpu.memory_space<vmem>>, %arg3: memref<8x4x96xbf16, #tpu.memory_space<vmem>>, %arg4: memref<32x96xbf16, #tpu.memory_space<vmem>>, %arg5: memref<1x96xf32, #tpu.memory_space<vmem>>, %arg6: memref<8x4x32xbf16, #tpu.memory_space<vmem>>, %arg7: memref<4x32xf32, #tpu.memory_space<vmem>>, %arg8: memref<4x32xf32, #tpu.memory_space<vmem>>) attributes {dimension_semantics = [#tpu.dimension_semantics<parallel>, #tpu.dimension_semantics<arbitrary>], iteration_bounds = array<i64: 1, 1>, scalar_prefetch = 0 : i64, scratch_operands = 1 : i64, tpu.core_type = #tpu.core_type<tc>, window_params = [{transform_indices = @transform_0, window_bounds = array<i64: 4, 1>}, {transform_indices = @transform_1, window_bounds = array<i64: 8, 4, 96>}, {pipeline_mode = #tpu.pipeline_mode<synchronous>, transform_indices = @transform_2, window_bounds = array<i64: 32, 96>}, {pipeline_mode = #tpu.pipeline_mode<synchronous>, transform_indices = @transform_3, window_bounds = array<i64: 1, 96>}, {transform_indices = @transform_4, window_bounds = array<i64: 8, 4, 32>}, {transform_indices = @transform_5, window_bounds = array<i64: 4, 32>}]} {
    %c0_i32 = arith.constant 0 : i32
    %0 = arith.cmpi eq, %arg1, %c0_i32 : i32
    %1 = arith.extui %0 : i1 to i32
    %c0_i32_0 = arith.constant 0 : i32
    %2 = arith.cmpi ne, %1, %c0_i32_0 : i32
    scf.if %2 {
      %cst_100 = arith.constant 0.000000e+00 : f32
      %459 = vector.broadcast %cst_100 : f32 to vector<4x32xf32>
      %c0_101 = arith.constant 0 : index
      %c0_102 = arith.constant 0 : index
      %460 = vector.load %arg8[%c0_101, %c0_102] : memref<4x32xf32, #tpu.memory_space<vmem>>, vector<4x32xf32>
      tpu.vector_store %arg8[%c0_101, %c0_102], %459 {strides = array<i32>} : memref<4x32xf32, #tpu.memory_space<vmem>>, vector<4x32xf32>,
    } else {
    }
    %c0 = arith.constant 0 : index
    %c0_1 = arith.constant 0 : index
    %3 = vector.load %arg2[%c0, %c0_1] : memref<4x1xi32, #tpu.memory_space<vmem>>, vector<4x1xi32>
    %c0_2 = arith.constant 0 : index
    %c0_3 = arith.constant 0 : index
    %4 = vector.load %arg4[%c0_2, %c0_3] : memref<32x96xbf16, #tpu.memory_space<vmem>>, vector<32x96xbf16>
    %c0_4 = arith.constant 0 : index
    %c0_5 = arith.constant 0 : index
    %5 = vector.load %arg5[%c0_4, %c0_5] : memref<1x96xf32, #tpu.memory_space<vmem>>, vector<1x96xf32>
    %c0_6 = arith.constant 0 : index
    %c0_7 = arith.constant 0 : index
    %6 = vector.load %arg8[%c0_6, %c0_7] : memref<4x32xf32, #tpu.memory_space<vmem>>, vector<4x32xf32>
    %c8_i32 = arith.constant 8 : i32
    %7 = arith.muli %arg1, %c8_i32 : i32
    %c0_i32_8 = arith.constant 0 : i32
    %8 = arith.addi %7, %c0_i32_8 : i32
    %9 = vector.broadcast %8 : i32 to vector<4x1xi32>
    %10 = arith.cmpi slt, %9, %3 : vector<4x1xi32>
    %11 = arith.extui %10 : vector<4x1xi1> to vector<4x1xi32>
    %12 = arith.sitofp %11 : vector<4x1xi32> to vector<4x1xf32>
    %13 = vector.broadcast %8 : i32 to vector<4x1xi32>
    %14 = arith.cmpi sle, %13, %3 : vector<4x1xi32>
    %15 = arith.extui %14 : vector<4x1xi1> to vector<4x1xi32>
    %16 = arith.sitofp %15 : vector<4x1xi32> to vector<4x1xf32>
    %17 = vector.broadcast %16 : vector<4x1xf32> to vector<4x32xf32>
    %18 = arith.mulf %17, %6 : vector<4x32xf32>
    %19 = arith.truncf %18 : vector<4x32xf32> to vector<4x32xbf16>
    %c0_9 = arith.constant 0 : index
    %c0_10 = arith.constant 0 : index
    %c0_11 = arith.constant 0 : index
    %20 = vector.load %arg6[%c0_9, %c0_10, %c0_11] : memref<8x4x32xbf16, #tpu.memory_space<vmem>>, vector<1x4x32xbf16>
    %21 = vector.shape_cast %20 : vector<1x4x32xbf16> to vector<4x32xbf16>
    %22 = vector.shape_cast %19 : vector<4x32xbf16> to vector<1x4x32xbf16>
    tpu.vector_store %arg6[%c0_9, %c0_10, %c0_11], %22 {strides = array<i32>} : memref<8x4x32xbf16, #tpu.memory_space<vmem>>, vector<1x4x32xbf16>,
    %c0_12 = arith.constant 0 : index
    %c0_13 = arith.constant 0 : index
    %c0_14 = arith.constant 0 : index
    %23 = vector.load %arg3[%c0_12, %c0_13, %c0_14] : memref<8x4x96xbf16, #tpu.memory_space<vmem>>, vector<1x4x96xbf16>
    %24 = vector.shape_cast %23 : vector<1x4x96xbf16> to vector<4x96xbf16>
    %25 = arith.extf %24 : vector<4x96xbf16> to vector<4x96xf32>
    %26 = arith.truncf %6 : vector<4x32xf32> to vector<4x32xbf16>
    %cst = arith.constant dense<0.000000e+00> : vector<4x96xf32>
    %27 = tpu.matmul %26, %4, %cst {dimension_numbers = #tpu.dot_dimension_numbers<[1], [0], [0], [1], [0, 0, 1, 1], [], []>} : vector<4x32xbf16>, vector<32x96xbf16>, vector<4x96xf32> -> vector<4x96xf32>
    %28 = vector.broadcast %5 : vector<1x96xf32> to vector<4x96xf32>
    %29 = arith.addf %27, %28 : vector<4x96xf32>
    %30 = vector.extract_strided_slice %25 {offsets = [0, 0], sizes = [4, 32], strides = [1, 1]} : vector<4x96xf32> to vector<4x32xf32>
    %31 = vector.extract_strided_slice %29 {offsets = [0, 0], sizes = [4, 32], strides = [1, 1]} : vector<4x96xf32> to vector<4x32xf32>
    %32 = arith.addf %30, %31 : vector<4x32xf32>
    %33 = arith.negf %32 : vector<4x32xf32>
    %34 = math.exp %33 : vector<4x32xf32>
    %cst_15 = arith.constant 1.000000e+00 : f32
    %35 = vector.broadcast %cst_15 : f32 to vector<4x32xf32>
    %36 = arith.addf %35, %34 : vector<4x32xf32>
    %37 = arith.divf %35, %36 : vector<4x32xf32>
    %38 = vector.extract_strided_slice %25 {offsets = [0, 32], sizes = [4, 32], strides = [1, 1]} : vector<4x96xf32> to vector<4x32xf32>
    %39 = vector.extract_strided_slice %29 {offsets = [0, 32], sizes = [4, 32], strides = [1, 1]} : vector<4x96xf32> to vector<4x32xf32>
    %40 = arith.addf %38, %39 : vector<4x32xf32>
    %41 = arith.negf %40 : vector<4x32xf32>
    %42 = math.exp %41 : vector<4x32xf32>
    %cst_16 = arith.constant 1.000000e+00 : f32
    %43 = vector.broadcast %cst_16 : f32 to vector<4x32xf32>
    %44 = arith.addf %43, %42 : vector<4x32xf32>
    %45 = arith.divf %43, %44 : vector<4x32xf32>
    %46 = vector.extract_strided_slice %25 {offsets = [0, 64], sizes = [4, 32], strides = [1, 1]} : vector<4x96xf32> to vector<4x32xf32>
    %47 = vector.extract_strided_slice %29 {offsets = [0, 64], sizes = [4, 32], strides = [1, 1]} : vector<4x96xf32> to vector<4x32xf32>
    %48 = arith.mulf %37, %47 : vector<4x32xf32>
    %49 = arith.addf %46, %48 : vector<4x32xf32>
    %50 = math.tanh %49 : vector<4x32xf32>
    %cst_17 = arith.constant 1.000000e+00 : f32
    %51 = vector.broadcast %cst_17 : f32 to vector<4x32xf32>
    %52 = arith.subf %51, %45 : vector<4x32xf32>
    %53 = arith.mulf %52, %50 : vector<4x32xf32>
    %54 = arith.mulf %45, %6 : vector<4x32xf32>
    %55 = arith.addf %53, %54 : vector<4x32xf32>
    %56 = vector.broadcast %12 : vector<4x1xf32> to vector<4x32xf32>
    %57 = arith.mulf %56, %55 : vector<4x32xf32>
    %cst_18 = arith.constant 1.000000e+00 : f32
    %58 = vector.broadcast %cst_18 : f32 to vector<4x1xf32>
    %59 = arith.subf %58, %12 : vector<4x1xf32>
    %60 = vector.broadcast %59 : vector<4x1xf32> to vector<4x32xf32>
    %61 = arith.mulf %60, %6 : vector<4x32xf32>
    %62 = arith.addf %57, %61 : vector<4x32xf32>
    %c8_i32_19 = arith.constant 8 : i32
    %63 = arith.muli %arg1, %c8_i32_19 : i32
    %c1_i32 = arith.constant 1 : i32
    %64 = arith.addi %63, %c1_i32 : i32
    %65 = vector.broadcast %64 : i32 to vector<4x1xi32>
    %66 = arith.cmpi slt, %65, %3 : vector<4x1xi32>
    %67 = arith.extui %66 : vector<4x1xi1> to vector<4x1xi32>
    %68 = arith.sitofp %67 : vector<4x1xi32> to vector<4x1xf32>
    %69 = vector.broadcast %64 : i32 to vector<4x1xi32>
    %70 = arith.cmpi sle, %69, %3 : vector<4x1xi32>
    %71 = arith.extui %70 : vector<4x1xi1> to vector<4x1xi32>
    %72 = arith.sitofp %71 : vector<4x1xi32> to vector<4x1xf32>
    %73 = vector.broadcast %72 : vector<4x1xf32> to vector<4x32xf32>
    %74 = arith.mulf %73, %62 : vector<4x32xf32>
    %75 = arith.truncf %74 : vector<4x32xf32> to vector<4x32xbf16>
    %c1 = arith.constant 1 : index
    %c0_20 = arith.constant 0 : index
    %c0_21 = arith.constant 0 : index
    %76 = vector.load %arg6[%c1, %c0_20, %c0_21] : memref<8x4x32xbf16, #tpu.memory_space<vmem>>, vector<1x4x32xbf16>
    %77 = vector.shape_cast %76 : vector<1x4x32xbf16> to vector<4x32xbf16>
    %78 = vector.shape_cast %75 : vector<4x32xbf16> to vector<1x4x32xbf16>
    tpu.vector_store %arg6[%c1, %c0_20, %c0_21], %78 {strides = array<i32>} : memref<8x4x32xbf16, #tpu.memory_space<vmem>>, vector<1x4x32xbf16>,
    %c1_22 = arith.constant 1 : index
    %c0_23 = arith.constant 0 : index
    %c0_24 = arith.constant 0 : index
    %79 = vector.load %arg3[%c1_22, %c0_23, %c0_24] : memref<8x4x96xbf16, #tpu.memory_space<vmem>>, vector<1x4x96xbf16>
    %80 = vector.shape_cast %79 : vector<1x4x96xbf16> to vector<4x96xbf16>
    %81 = arith.extf %80 : vector<4x96xbf16> to vector<4x96xf32>
    %82 = arith.truncf %62 : vector<4x32xf32> to vector<4x32xbf16>
    %cst_25 = arith.constant dense<0.000000e+00> : vector<4x96xf32>
    %83 = tpu.matmul %82, %4, %cst_25 {dimension_numbers = #tpu.dot_dimension_numbers<[1], [0], [0], [1], [0, 0, 1, 1], [], []>} : vector<4x32xbf16>, vector<32x96xbf16>, vector<4x96xf32> -> vector<4x96xf32>
    %84 = vector.broadcast %5 : vector<1x96xf32> to vector<4x96xf32>
    %85 = arith.addf %83, %84 : vector<4x96xf32>
    %86 = vector.extract_strided_slice %81 {offsets = [0, 0], sizes = [4, 32], strides = [1, 1]} : vector<4x96xf32> to vector<4x32xf32>
    %87 = vector.extract_strided_slice %85 {offsets = [0, 0], sizes = [4, 32], strides = [1, 1]} : vector<4x96xf32> to vector<4x32xf32>
    %88 = arith.addf %86, %87 : vector<4x32xf32>
    %89 = arith.negf %88 : vector<4x32xf32>
    %90 = math.exp %89 : vector<4x32xf32>
    %cst_26 = arith.constant 1.000000e+00 : f32
    %91 = vector.broadcast %cst_26 : f32 to vector<4x32xf32>
    %92 = arith.addf %91, %90 : vector<4x32xf32>
    %93 = arith.divf %91, %92 : vector<4x32xf32>
    %94 = vector.extract_strided_slice %81 {offsets = [0, 32], sizes = [4, 32], strides = [1, 1]} : vector<4x96xf32> to vector<4x32xf32>
    %95 = vector.extract_strided_slice %85 {offsets = [0, 32], sizes = [4, 32], strides = [1, 1]} : vector<4x96xf32> to vector<4x32xf32>
    %96 = arith.addf %94, %95 : vector<4x32xf32>
    %97 = arith.negf %96 : vector<4x32xf32>
    %98 = math.exp %97 : vector<4x32xf32>
    %cst_27 = arith.constant 1.000000e+00 : f32
    %99 = vector.broadcast %cst_27 : f32 to vector<4x32xf32>
    %100 = arith.addf %99, %98 : vector<4x32xf32>
    %101 = arith.divf %99, %100 : vector<4x32xf32>
    %102 = vector.extract_strided_slice %81 {offsets = [0, 64], sizes = [4, 32], strides = [1, 1]} : vector<4x96xf32> to vector<4x32xf32>
    %103 = vector.extract_strided_slice %85 {offsets = [0, 64], sizes = [4, 32], strides = [1, 1]} : vector<4x96xf32> to vector<4x32xf32>
    %104 = arith.mulf %93, %103 : vector<4x32xf32>
    %105 = arith.addf %102, %104 : vector<4x32xf32>
    %106 = math.tanh %105 : vector<4x32xf32>
    %cst_28 = arith.constant 1.000000e+00 : f32
    %107 = vector.broadcast %cst_28 : f32 to vector<4x32xf32>
    %108 = arith.subf %107, %101 : vector<4x32xf32>
    %109 = arith.mulf %108, %106 : vector<4x32xf32>
    %110 = arith.mulf %101, %62 : vector<4x32xf32>
    %111 = arith.addf %109, %110 : vector<4x32xf32>
    %112 = vector.broadcast %68 : vector<4x1xf32> to vector<4x32xf32>
    %113 = arith.mulf %112, %111 : vector<4x32xf32>
    %cst_29 = arith.constant 1.000000e+00 : f32
    %114 = vector.broadcast %cst_29 : f32 to vector<4x1xf32>
    %115 = arith.subf %114, %68 : vector<4x1xf32>
    %116 = vector.broadcast %115 : vector<4x1xf32> to vector<4x32xf32>
    %117 = arith.mulf %116, %62 : vector<4x32xf32>
    %118 = arith.addf %113, %117 : vector<4x32xf32>
    %c8_i32_30 = arith.constant 8 : i32
    %119 = arith.muli %arg1, %c8_i32_30 : i32
    %c2_i32 = arith.constant 2 : i32
    %120 = arith.addi %119, %c2_i32 : i32
    %121 = vector.broadcast %120 : i32 to vector<4x1xi32>
    %122 = arith.cmpi slt, %121, %3 : vector<4x1xi32>
    %123 = arith.extui %122 : vector<4x1xi1> to vector<4x1xi32>
    %124 = arith.sitofp %123 : vector<4x1xi32> to vector<4x1xf32>
    %125 = vector.broadcast %120 : i32 to vector<4x1xi32>
    %126 = arith.cmpi sle, %125, %3 : vector<4x1xi32>
    %127 = arith.extui %126 : vector<4x1xi1> to vector<4x1xi32>
    %128 = arith.sitofp %127 : vector<4x1xi32> to vector<4x1xf32>
    %129 = vector.broadcast %128 : vector<4x1xf32> to vector<4x32xf32>
    %130 = arith.mulf %129, %118 : vector<4x32xf32>
    %131 = arith.truncf %130 : vector<4x32xf32> to vector<4x32xbf16>
    %c2 = arith.constant 2 : index
    %c0_31 = arith.constant 0 : index
    %c0_32 = arith.constant 0 : index
    %132 = vector.load %arg6[%c2, %c0_31, %c0_32] : memref<8x4x32xbf16, #tpu.memory_space<vmem>>, vector<1x4x32xbf16>
    %133 = vector.shape_cast %132 : vector<1x4x32xbf16> to vector<4x32xbf16>
    %134 = vector.shape_cast %131 : vector<4x32xbf16> to vector<1x4x32xbf16>
    tpu.vector_store %arg6[%c2, %c0_31, %c0_32], %134 {strides = array<i32>} : memref<8x4x32xbf16, #tpu.memory_space<vmem>>, vector<1x4x32xbf16>,
    %c2_33 = arith.constant 2 : index
    %c0_34 = arith.constant 0 : index
    %c0_35 = arith.constant 0 : index
    %135 = vector.load %arg3[%c2_33, %c0_34, %c0_35] : memref<8x4x96xbf16, #tpu.memory_space<vmem>>, vector<1x4x96xbf16>
    %136 = vector.shape_cast %135 : vector<1x4x96xbf16> to vector<4x96xbf16>
    %137 = arith.extf %136 : vector<4x96xbf16> to vector<4x96xf32>
    %138 = arith.truncf %118 : vector<4x32xf32> to vector<4x32xbf16>
    %cst_36 = arith.constant dense<0.000000e+00> : vector<4x96xf32>
    %139 = tpu.matmul %138, %4, %cst_36 {dimension_numbers = #tpu.dot_dimension_numbers<[1], [0], [0], [1], [0, 0, 1, 1], [], []>} : vector<4x32xbf16>, vector<32x96xbf16>, vector<4x96xf32> -> vector<4x96xf32>
    %140 = vector.broadcast %5 : vector<1x96xf32> to vector<4x96xf32>
    %141 = arith.addf %139, %140 : vector<4x96xf32>
    %142 = vector.extract_strided_slice %137 {offsets = [0, 0], sizes = [4, 32], strides = [1, 1]} : vector<4x96xf32> to vector<4x32xf32>
    %143 = vector.extract_strided_slice %141 {offsets = [0, 0], sizes = [4, 32], strides = [1, 1]} : vector<4x96xf32> to vector<4x32xf32>
    %144 = arith.addf %142, %143 : vector<4x32xf32>
    %145 = arith.negf %144 : vector<4x32xf32>
    %146 = math.exp %145 : vector<4x32xf32>
    %cst_37 = arith.constant 1.000000e+00 : f32
    %147 = vector.broadcast %cst_37 : f32 to vector<4x32xf32>
    %148 = arith.addf %147, %146 : vector<4x32xf32>
    %149 = arith.divf %147, %148 : vector<4x32xf32>
    %150 = vector.extract_strided_slice %137 {offsets = [0, 32], sizes = [4, 32], strides = [1, 1]} : vector<4x96xf32> to vector<4x32xf32>
    %151 = vector.extract_strided_slice %141 {offsets = [0, 32], sizes = [4, 32], strides = [1, 1]} : vector<4x96xf32> to vector<4x32xf32>
    %152 = arith.addf %150, %151 : vector<4x32xf32>
    %153 = arith.negf %152 : vector<4x32xf32>
    %154 = math.exp %153 : vector<4x32xf32>
    %cst_38 = arith.constant 1.000000e+00 : f32
    %155 = vector.broadcast %cst_38 : f32 to vector<4x32xf32>
    %156 = arith.addf %155, %154 : vector<4x32xf32>
    %157 = arith.divf %155, %156 : vector<4x32xf32>
    %158 = vector.extract_strided_slice %137 {offsets = [0, 64], sizes = [4, 32], strides = [1, 1]} : vector<4x96xf32> to vector<4x32xf32>
    %159 = vector.extract_strided_slice %141 {offsets = [0, 64], sizes = [4, 32], strides = [1, 1]} : vector<4x96xf32> to vector<4x32xf32>
    %160 = arith.mulf %149, %159 : vector<4x32xf32>
    %161 = arith.addf %158, %160 : vector<4x32xf32>
    %162 = math.tanh %161 : vector<4x32xf32>
    %cst_39 = arith.constant 1.000000e+00 : f32
    %163 = vector.broadcast %cst_39 : f32 to vector<4x32xf32>
    %164 = arith.subf %163, %157 : vector<4x32xf32>
    %165 = arith.mulf %164, %162 : vector<4x32xf32>
    %166 = arith.mulf %157, %118 : vector<4x32xf32>
    %167 = arith.addf %165, %166 : vector<4x32xf32>
    %168 = vector.broadcast %124 : vector<4x1xf32> to vector<4x32xf32>
    %169 = arith.mulf %168, %167 : vector<4x32xf32>
    %cst_40 = arith.constant 1.000000e+00 : f32
    %170 = vector.broadcast %cst_40 : f32 to vector<4x1xf32>
    %171 = arith.subf %170, %124 : vector<4x1xf32>
    %172 = vector.broadcast %171 : vector<4x1xf32> to vector<4x32xf32>
    %173 = arith.mulf %172, %118 : vector<4x32xf32>
    %174 = arith.addf %169, %173 : vector<4x32xf32>
    %c8_i32_41 = arith.constant 8 : i32
    %175 = arith.muli %arg1, %c8_i32_41 : i32
    %c3_i32 = arith.constant 3 : i32
    %176 = arith.addi %175, %c3_i32 : i32
    %177 = vector.broadcast %176 : i32 to vector<4x1xi32>
    %178 = arith.cmpi slt, %177, %3 : vector<4x1xi32>
    %179 = arith.extui %178 : vector<4x1xi1> to vector<4x1xi32>
    %180 = arith.sitofp %179 : vector<4x1xi32> to vector<4x1xf32>
    %181 = vector.broadcast %176 : i32 to vector<4x1xi32>
    %182 = arith.cmpi sle, %181, %3 : vector<4x1xi32>
    %183 = arith.extui %182 : vector<4x1xi1> to vector<4x1xi32>
    %184 = arith.sitofp %183 : vector<4x1xi32> to vector<4x1xf32>
    %185 = vector.broadcast %184 : vector<4x1xf32> to vector<4x32xf32>
    %186 = arith.mulf %185, %174 : vector<4x32xf32>
    %187 = arith.truncf %186 : vector<4x32xf32> to vector<4x32xbf16>
    %c3 = arith.constant 3 : index
    %c0_42 = arith.constant 0 : index
    %c0_43 = arith.constant 0 : index
    %188 = vector.load %arg6[%c3, %c0_42, %c0_43] : memref<8x4x32xbf16, #tpu.memory_space<vmem>>, vector<1x4x32xbf16>
    %189 = vector.shape_cast %188 : vector<1x4x32xbf16> to vector<4x32xbf16>
    %190 = vector.shape_cast %187 : vector<4x32xbf16> to vector<1x4x32xbf16>
    tpu.vector_store %arg6[%c3, %c0_42, %c0_43], %190 {strides = array<i32>} : memref<8x4x32xbf16, #tpu.memory_space<vmem>>, vector<1x4x32xbf16>,
    %c3_44 = arith.constant 3 : index
    %c0_45 = arith.constant 0 : index
    %c0_46 = arith.constant 0 : index
    %191 = vector.load %arg3[%c3_44, %c0_45, %c0_46] : memref<8x4x96xbf16, #tpu.memory_space<vmem>>, vector<1x4x96xbf16>
    %192 = vector.shape_cast %191 : vector<1x4x96xbf16> to vector<4x96xbf16>
    %193 = arith.extf %192 : vector<4x96xbf16> to vector<4x96xf32>
    %194 = arith.truncf %174 : vector<4x32xf32> to vector<4x32xbf16>
    %cst_47 = arith.constant dense<0.000000e+00> : vector<4x96xf32>
    %195 = tpu.matmul %194, %4, %cst_47 {dimension_numbers = #tpu.dot_dimension_numbers<[1], [0], [0], [1], [0, 0, 1, 1], [], []>} : vector<4x32xbf16>, vector<32x96xbf16>, vector<4x96xf32> -> vector<4x96xf32>
    %196 = vector.broadcast %5 : vector<1x96xf32> to vector<4x96xf32>
    %197 = arith.addf %195, %196 : vector<4x96xf32>
    %198 = vector.extract_strided_slice %193 {offsets = [0, 0], sizes = [4, 32], strides = [1, 1]} : vector<4x96xf32> to vector<4x32xf32>
    %199 = vector.extract_strided_slice %197 {offsets = [0, 0], sizes = [4, 32], strides = [1, 1]} : vector<4x96xf32> to vector<4x32xf32>
    %200 = arith.addf %198, %199 : vector<4x32xf32>
    %201 = arith.negf %200 : vector<4x32xf32>
    %202 = math.exp %201 : vector<4x32xf32>
    %cst_48 = arith.constant 1.000000e+00 : f32
    %203 = vector.broadcast %cst_48 : f32 to vector<4x32xf32>
    %204 = arith.addf %203, %202 : vector<4x32xf32>
    %205 = arith.divf %203, %204 : vector<4x32xf32>
    %206 = vector.extract_strided_slice %193 {offsets = [0, 32], sizes = [4, 32], strides = [1, 1]} : vector<4x96xf32> to vector<4x32xf32>
    %207 = vector.extract_strided_slice %197 {offsets = [0, 32], sizes = [4, 32], strides = [1, 1]} : vector<4x96xf32> to vector<4x32xf32>
    %208 = arith.addf %206, %207 : vector<4x32xf32>
    %209 = arith.negf %208 : vector<4x32xf32>
    %210 = math.exp %209 : vector<4x32xf32>
    %cst_49 = arith.constant 1.000000e+00 : f32
    %211 = vector.broadcast %cst_49 : f32 to vector<4x32xf32>
    %212 = arith.addf %211, %210 : vector<4x32xf32>
    %213 = arith.divf %211, %212 : vector<4x32xf32>
    %214 = vector.extract_strided_slice %193 {offsets = [0, 64], sizes = [4, 32], strides = [1, 1]} : vector<4x96xf32> to vector<4x32xf32>
    %215 = vector.extract_strided_slice %197 {offsets = [0, 64], sizes = [4, 32], strides = [1, 1]} : vector<4x96xf32> to vector<4x32xf32>
    %216 = arith.mulf %205, %215 : vector<4x32xf32>
    %217 = arith.addf %214, %216 : vector<4x32xf32>
    %218 = math.tanh %217 : vector<4x32xf32>
    %cst_50 = arith.constant 1.000000e+00 : f32
    %219 = vector.broadcast %cst_50 : f32 to vector<4x32xf32>
    %220 = arith.subf %219, %213 : vector<4x32xf32>
    %221 = arith.mulf %220, %218 : vector<4x32xf32>
    %222 = arith.mulf %213, %174 : vector<4x32xf32>
    %223 = arith.addf %221, %222 : vector<4x32xf32>
    %224 = vector.broadcast %180 : vector<4x1xf32> to vector<4x32xf32>
    %225 = arith.mulf %224, %223 : vector<4x32xf32>
    %cst_51 = arith.constant 1.000000e+00 : f32
    %226 = vector.broadcast %cst_51 : f32 to vector<4x1xf32>
    %227 = arith.subf %226, %180 : vector<4x1xf32>
    %228 = vector.broadcast %227 : vector<4x1xf32> to vector<4x32xf32>
    %229 = arith.mulf %228, %174 : vector<4x32xf32>
    %230 = arith.addf %225, %229 : vector<4x32xf32>
    %c8_i32_52 = arith.constant 8 : i32
    %231 = arith.muli %arg1, %c8_i32_52 : i32
    %c4_i32 = arith.constant 4 : i32
    %232 = arith.addi %231, %c4_i32 : i32
    %233 = vector.broadcast %232 : i32 to vector<4x1xi32>
    %234 = arith.cmpi slt, %233, %3 : vector<4x1xi32>
    %235 = arith.extui %234 : vector<4x1xi1> to vector<4x1xi32>
    %236 = arith.sitofp %235 : vector<4x1xi32> to vector<4x1xf32>
    %237 = vector.broadcast %232 : i32 to vector<4x1xi32>
    %238 = arith.cmpi sle, %237, %3 : vector<4x1xi32>
    %239 = arith.extui %238 : vector<4x1xi1> to vector<4x1xi32>
    %240 = arith.sitofp %239 : vector<4x1xi32> to vector<4x1xf32>
    %241 = vector.broadcast %240 : vector<4x1xf32> to vector<4x32xf32>
    %242 = arith.mulf %241, %230 : vector<4x32xf32>
    %243 = arith.truncf %242 : vector<4x32xf32> to vector<4x32xbf16>
    %c4 = arith.constant 4 : index
    %c0_53 = arith.constant 0 : index
    %c0_54 = arith.constant 0 : index
    %244 = vector.load %arg6[%c4, %c0_53, %c0_54] : memref<8x4x32xbf16, #tpu.memory_space<vmem>>, vector<1x4x32xbf16>
    %245 = vector.shape_cast %244 : vector<1x4x32xbf16> to vector<4x32xbf16>
    %246 = vector.shape_cast %243 : vector<4x32xbf16> to vector<1x4x32xbf16>
    tpu.vector_store %arg6[%c4, %c0_53, %c0_54], %246 {strides = array<i32>} : memref<8x4x32xbf16, #tpu.memory_space<vmem>>, vector<1x4x32xbf16>,
    %c4_55 = arith.constant 4 : index
    %c0_56 = arith.constant 0 : index
    %c0_57 = arith.constant 0 : index
    %247 = vector.load %arg3[%c4_55, %c0_56, %c0_57] : memref<8x4x96xbf16, #tpu.memory_space<vmem>>, vector<1x4x96xbf16>
    %248 = vector.shape_cast %247 : vector<1x4x96xbf16> to vector<4x96xbf16>
    %249 = arith.extf %248 : vector<4x96xbf16> to vector<4x96xf32>
    %250 = arith.truncf %230 : vector<4x32xf32> to vector<4x32xbf16>
    %cst_58 = arith.constant dense<0.000000e+00> : vector<4x96xf32>
    %251 = tpu.matmul %250, %4, %cst_58 {dimension_numbers = #tpu.dot_dimension_numbers<[1], [0], [0], [1], [0, 0, 1, 1], [], []>} : vector<4x32xbf16>, vector<32x96xbf16>, vector<4x96xf32> -> vector<4x96xf32>
    %252 = vector.broadcast %5 : vector<1x96xf32> to vector<4x96xf32>
    %253 = arith.addf %251, %252 : vector<4x96xf32>
    %254 = vector.extract_strided_slice %249 {offsets = [0, 0], sizes = [4, 32], strides = [1, 1]} : vector<4x96xf32> to vector<4x32xf32>
    %255 = vector.extract_strided_slice %253 {offsets = [0, 0], sizes = [4, 32], strides = [1, 1]} : vector<4x96xf32> to vector<4x32xf32>
    %256 = arith.addf %254, %255 : vector<4x32xf32>
    %257 = arith.negf %256 : vector<4x32xf32>
    %258 = math.exp %257 : vector<4x32xf32>
    %cst_59 = arith.constant 1.000000e+00 : f32
    %259 = vector.broadcast %cst_59 : f32 to vector<4x32xf32>
    %260 = arith.addf %259, %258 : vector<4x32xf32>
    %261 = arith.divf %259, %260 : vector<4x32xf32>
    %262 = vector.extract_strided_slice %249 {offsets = [0, 32], sizes = [4, 32], strides = [1, 1]} : vector<4x96xf32> to vector<4x32xf32>
    %263 = vector.extract_strided_slice %253 {offsets = [0, 32], sizes = [4, 32], strides = [1, 1]} : vector<4x96xf32> to vector<4x32xf32>
    %264 = arith.addf %262, %263 : vector<4x32xf32>
    %265 = arith.negf %264 : vector<4x32xf32>
    %266 = math.exp %265 : vector<4x32xf32>
    %cst_60 = arith.constant 1.000000e+00 : f32
    %267 = vector.broadcast %cst_60 : f32 to vector<4x32xf32>
    %268 = arith.addf %267, %266 : vector<4x32xf32>
    %269 = arith.divf %267, %268 : vector<4x32xf32>
    %270 = vector.extract_strided_slice %249 {offsets = [0, 64], sizes = [4, 32], strides = [1, 1]} : vector<4x96xf32> to vector<4x32xf32>
    %271 = vector.extract_strided_slice %253 {offsets = [0, 64], sizes = [4, 32], strides = [1, 1]} : vector<4x96xf32> to vector<4x32xf32>
    %272 = arith.mulf %261, %271 : vector<4x32xf32>
    %273 = arith.addf %270, %272 : vector<4x32xf32>
    %274 = math.tanh %273 : vector<4x32xf32>
    %cst_61 = arith.constant 1.000000e+00 : f32
    %275 = vector.broadcast %cst_61 : f32 to vector<4x32xf32>
    %276 = arith.subf %275, %269 : vector<4x32xf32>
    %277 = arith.mulf %276, %274 : vector<4x32xf32>
    %278 = arith.mulf %269, %230 : vector<4x32xf32>
    %279 = arith.addf %277, %278 : vector<4x32xf32>
    %280 = vector.broadcast %236 : vector<4x1xf32> to vector<4x32xf32>
    %281 = arith.mulf %280, %279 : vector<4x32xf32>
    %cst_62 = arith.constant 1.000000e+00 : f32
    %282 = vector.broadcast %cst_62 : f32 to vector<4x1xf32>
    %283 = arith.subf %282, %236 : vector<4x1xf32>
    %284 = vector.broadcast %283 : vector<4x1xf32> to vector<4x32xf32>
    %285 = arith.mulf %284, %230 : vector<4x32xf32>
    %286 = arith.addf %281, %285 : vector<4x32xf32>
    %c8_i32_63 = arith.constant 8 : i32
    %287 = arith.muli %arg1, %c8_i32_63 : i32
    %c5_i32 = arith.constant 5 : i32
    %288 = arith.addi %287, %c5_i32 : i32
    %289 = vector.broadcast %288 : i32 to vector<4x1xi32>
    %290 = arith.cmpi slt, %289, %3 : vector<4x1xi32>
    %291 = arith.extui %290 : vector<4x1xi1> to vector<4x1xi32>
    %292 = arith.sitofp %291 : vector<4x1xi32> to vector<4x1xf32>
    %293 = vector.broadcast %288 : i32 to vector<4x1xi32>
    %294 = arith.cmpi sle, %293, %3 : vector<4x1xi32>
    %295 = arith.extui %294 : vector<4x1xi1> to vector<4x1xi32>
    %296 = arith.sitofp %295 : vector<4x1xi32> to vector<4x1xf32>
    %297 = vector.broadcast %296 : vector<4x1xf32> to vector<4x32xf32>
    %298 = arith.mulf %297, %286 : vector<4x32xf32>
    %299 = arith.truncf %298 : vector<4x32xf32> to vector<4x32xbf16>
    %c5 = arith.constant 5 : index
    %c0_64 = arith.constant 0 : index
    %c0_65 = arith.constant 0 : index
    %300 = vector.load %arg6[%c5, %c0_64, %c0_65] : memref<8x4x32xbf16, #tpu.memory_space<vmem>>, vector<1x4x32xbf16>
    %301 = vector.shape_cast %300 : vector<1x4x32xbf16> to vector<4x32xbf16>
    %302 = vector.shape_cast %299 : vector<4x32xbf16> to vector<1x4x32xbf16>
    tpu.vector_store %arg6[%c5, %c0_64, %c0_65], %302 {strides = array<i32>} : memref<8x4x32xbf16, #tpu.memory_space<vmem>>, vector<1x4x32xbf16>,
    %c5_66 = arith.constant 5 : index
    %c0_67 = arith.constant 0 : index
    %c0_68 = arith.constant 0 : index
    %303 = vector.load %arg3[%c5_66, %c0_67, %c0_68] : memref<8x4x96xbf16, #tpu.memory_space<vmem>>, vector<1x4x96xbf16>
    %304 = vector.shape_cast %303 : vector<1x4x96xbf16> to vector<4x96xbf16>
    %305 = arith.extf %304 : vector<4x96xbf16> to vector<4x96xf32>
    %306 = arith.truncf %286 : vector<4x32xf32> to vector<4x32xbf16>
    %cst_69 = arith.constant dense<0.000000e+00> : vector<4x96xf32>
    %307 = tpu.matmul %306, %4, %cst_69 {dimension_numbers = #tpu.dot_dimension_numbers<[1], [0], [0], [1], [0, 0, 1, 1], [], []>} : vector<4x32xbf16>, vector<32x96xbf16>, vector<4x96xf32> -> vector<4x96xf32>
    %308 = vector.broadcast %5 : vector<1x96xf32> to vector<4x96xf32>
    %309 = arith.addf %307, %308 : vector<4x96xf32>
    %310 = vector.extract_strided_slice %305 {offsets = [0, 0], sizes = [4, 32], strides = [1, 1]} : vector<4x96xf32> to vector<4x32xf32>
    %311 = vector.extract_strided_slice %309 {offsets = [0, 0], sizes = [4, 32], strides = [1, 1]} : vector<4x96xf32> to vector<4x32xf32>
    %312 = arith.addf %310, %311 : vector<4x32xf32>
    %313 = arith.negf %312 : vector<4x32xf32>
    %314 = math.exp %313 : vector<4x32xf32>
    %cst_70 = arith.constant 1.000000e+00 : f32
    %315 = vector.broadcast %cst_70 : f32 to vector<4x32xf32>
    %316 = arith.addf %315, %314 : vector<4x32xf32>
    %317 = arith.divf %315, %316 : vector<4x32xf32>
    %318 = vector.extract_strided_slice %305 {offsets = [0, 32], sizes = [4, 32], strides = [1, 1]} : vector<4x96xf32> to vector<4x32xf32>
    %319 = vector.extract_strided_slice %309 {offsets = [0, 32], sizes = [4, 32], strides = [1, 1]} : vector<4x96xf32> to vector<4x32xf32>
    %320 = arith.addf %318, %319 : vector<4x32xf32>
    %321 = arith.negf %320 : vector<4x32xf32>
    %322 = math.exp %321 : vector<4x32xf32>
    %cst_71 = arith.constant 1.000000e+00 : f32
    %323 = vector.broadcast %cst_71 : f32 to vector<4x32xf32>
    %324 = arith.addf %323, %322 : vector<4x32xf32>
    %325 = arith.divf %323, %324 : vector<4x32xf32>
    %326 = vector.extract_strided_slice %305 {offsets = [0, 64], sizes = [4, 32], strides = [1, 1]} : vector<4x96xf32> to vector<4x32xf32>
    %327 = vector.extract_strided_slice %309 {offsets = [0, 64], sizes = [4, 32], strides = [1, 1]} : vector<4x96xf32> to vector<4x32xf32>
    %328 = arith.mulf %317, %327 : vector<4x32xf32>
    %329 = arith.addf %326, %328 : vector<4x32xf32>
    %330 = math.tanh %329 : vector<4x32xf32>
    %cst_72 = arith.constant 1.000000e+00 : f32
    %331 = vector.broadcast %cst_72 : f32 to vector<4x32xf32>
    %332 = arith.subf %331, %325 : vector<4x32xf32>
    %333 = arith.mulf %332, %330 : vector<4x32xf32>
    %334 = arith.mulf %325, %286 : vector<4x32xf32>
    %335 = arith.addf %333, %334 : vector<4x32xf32>
    %336 = vector.broadcast %292 : vector<4x1xf32> to vector<4x32xf32>
    %337 = arith.mulf %336, %335 : vector<4x32xf32>
    %cst_73 = arith.constant 1.000000e+00 : f32
    %338 = vector.broadcast %cst_73 : f32 to vector<4x1xf32>
    %339 = arith.subf %338, %292 : vector<4x1xf32>
    %340 = vector.broadcast %339 : vector<4x1xf32> to vector<4x32xf32>
    %341 = arith.mulf %340, %286 : vector<4x32xf32>
    %342 = arith.addf %337, %341 : vector<4x32xf32>
    %c8_i32_74 = arith.constant 8 : i32
    %343 = arith.muli %arg1, %c8_i32_74 : i32
    %c6_i32 = arith.constant 6 : i32
    %344 = arith.addi %343, %c6_i32 : i32
    %345 = vector.broadcast %344 : i32 to vector<4x1xi32>
    %346 = arith.cmpi slt, %345, %3 : vector<4x1xi32>
    %347 = arith.extui %346 : vector<4x1xi1> to vector<4x1xi32>
    %348 = arith.sitofp %347 : vector<4x1xi32> to vector<4x1xf32>
    %349 = vector.broadcast %344 : i32 to vector<4x1xi32>
    %350 = arith.cmpi sle, %349, %3 : vector<4x1xi32>
    %351 = arith.extui %350 : vector<4x1xi1> to vector<4x1xi32>
    %352 = arith.sitofp %351 : vector<4x1xi32> to vector<4x1xf32>
    %353 = vector.broadcast %352 : vector<4x1xf32> to vector<4x32xf32>
    %354 = arith.mulf %353, %342 : vector<4x32xf32>
    %355 = arith.truncf %354 : vector<4x32xf32> to vector<4x32xbf16>
    %c6 = arith.constant 6 : index
    %c0_75 = arith.constant 0 : index
    %c0_76 = arith.constant 0 : index
    %356 = vector.load %arg6[%c6, %c0_75, %c0_76] : memref<8x4x32xbf16, #tpu.memory_space<vmem>>, vector<1x4x32xbf16>
    %357 = vector.shape_cast %356 : vector<1x4x32xbf16> to vector<4x32xbf16>
    %358 = vector.shape_cast %355 : vector<4x32xbf16> to vector<1x4x32xbf16>
    tpu.vector_store %arg6[%c6, %c0_75, %c0_76], %358 {strides = array<i32>} : memref<8x4x32xbf16, #tpu.memory_space<vmem>>, vector<1x4x32xbf16>,
    %c6_77 = arith.constant 6 : index
    %c0_78 = arith.constant 0 : index
    %c0_79 = arith.constant 0 : index
    %359 = vector.load %arg3[%c6_77, %c0_78, %c0_79] : memref<8x4x96xbf16, #tpu.memory_space<vmem>>, vector<1x4x96xbf16>
    %360 = vector.shape_cast %359 : vector<1x4x96xbf16> to vector<4x96xbf16>
    %361 = arith.extf %360 : vector<4x96xbf16> to vector<4x96xf32>
    %362 = arith.truncf %342 : vector<4x32xf32> to vector<4x32xbf16>
    %cst_80 = arith.constant dense<0.000000e+00> : vector<4x96xf32>
    %363 = tpu.matmul %362, %4, %cst_80 {dimension_numbers = #tpu.dot_dimension_numbers<[1], [0], [0], [1], [0, 0, 1, 1], [], []>} : vector<4x32xbf16>, vector<32x96xbf16>, vector<4x96xf32> -> vector<4x96xf32>
    %364 = vector.broadcast %5 : vector<1x96xf32> to vector<4x96xf32>
    %365 = arith.addf %363, %364 : vector<4x96xf32>
    %366 = vector.extract_strided_slice %361 {offsets = [0, 0], sizes = [4, 32], strides = [1, 1]} : vector<4x96xf32> to vector<4x32xf32>
    %367 = vector.extract_strided_slice %365 {offsets = [0, 0], sizes = [4, 32], strides = [1, 1]} : vector<4x96xf32> to vector<4x32xf32>
    %368 = arith.addf %366, %367 : vector<4x32xf32>
    %369 = arith.negf %368 : vector<4x32xf32>
    %370 = math.exp %369 : vector<4x32xf32>
    %cst_81 = arith.constant 1.000000e+00 : f32
    %371 = vector.broadcast %cst_81 : f32 to vector<4x32xf32>
    %372 = arith.addf %371, %370 : vector<4x32xf32>
    %373 = arith.divf %371, %372 : vector<4x32xf32>
    %374 = vector.extract_strided_slice %361 {offsets = [0, 32], sizes = [4, 32], strides = [1, 1]} : vector<4x96xf32> to vector<4x32xf32>
    %375 = vector.extract_strided_slice %365 {offsets = [0, 32], sizes = [4, 32], strides = [1, 1]} : vector<4x96xf32> to vector<4x32xf32>
    %376 = arith.addf %374, %375 : vector<4x32xf32>
    %377 = arith.negf %376 : vector<4x32xf32>
    %378 = math.exp %377 : vector<4x32xf32>
    %cst_82 = arith.constant 1.000000e+00 : f32
    %379 = vector.broadcast %cst_82 : f32 to vector<4x32xf32>
    %380 = arith.addf %379, %378 : vector<4x32xf32>
    %381 = arith.divf %379, %380 : vector<4x32xf32>
    %382 = vector.extract_strided_slice %361 {offsets = [0, 64], sizes = [4, 32], strides = [1, 1]} : vector<4x96xf32> to vector<4x32xf32>
    %383 = vector.extract_strided_slice %365 {offsets = [0, 64], sizes = [4, 32], strides = [1, 1]} : vector<4x96xf32> to vector<4x32xf32>
    %384 = arith.mulf %373, %383 : vector<4x32xf32>
    %385 = arith.addf %382, %384 : vector<4x32xf32>
    %386 = math.tanh %385 : vector<4x32xf32>
    %cst_83 = arith.constant 1.000000e+00 : f32
    %387 = vector.broadcast %cst_83 : f32 to vector<4x32xf32>
    %388 = arith.subf %387, %381 : vector<4x32xf32>
    %389 = arith.mulf %388, %386 : vector<4x32xf32>
    %390 = arith.mulf %381, %342 : vector<4x32xf32>
    %391 = arith.addf %389, %390 : vector<4x32xf32>
    %392 = vector.broadcast %348 : vector<4x1xf32> to vector<4x32xf32>
    %393 = arith.mulf %392, %391 : vector<4x32xf32>
    %cst_84 = arith.constant 1.000000e+00 : f32
    %394 = vector.broadcast %cst_84 : f32 to vector<4x1xf32>
    %395 = arith.subf %394, %348 : vector<4x1xf32>
    %396 = vector.broadcast %395 : vector<4x1xf32> to vector<4x32xf32>
    %397 = arith.mulf %396, %342 : vector<4x32xf32>
    %398 = arith.addf %393, %397 : vector<4x32xf32>
    %c8_i32_85 = arith.constant 8 : i32
    %399 = arith.muli %arg1, %c8_i32_85 : i32
    %c7_i32 = arith.constant 7 : i32
    %400 = arith.addi %399, %c7_i32 : i32
    %401 = vector.broadcast %400 : i32 to vector<4x1xi32>
    %402 = arith.cmpi slt, %401, %3 : vector<4x1xi32>
    %403 = arith.extui %402 : vector<4x1xi1> to vector<4x1xi32>
    %404 = arith.sitofp %403 : vector<4x1xi32> to vector<4x1xf32>
    %405 = vector.broadcast %400 : i32 to vector<4x1xi32>
    %406 = arith.cmpi sle, %405, %3 : vector<4x1xi32>
    %407 = arith.extui %406 : vector<4x1xi1> to vector<4x1xi32>
    %408 = arith.sitofp %407 : vector<4x1xi32> to vector<4x1xf32>
    %409 = vector.broadcast %408 : vector<4x1xf32> to vector<4x32xf32>
    %410 = arith.mulf %409, %398 : vector<4x32xf32>
    %411 = arith.truncf %410 : vector<4x32xf32> to vector<4x32xbf16>
    %c7 = arith.constant 7 : index
    %c0_86 = arith.constant 0 : index
    %c0_87 = arith.constant 0 : index
    %412 = vector.load %arg6[%c7, %c0_86, %c0_87] : memref<8x4x32xbf16, #tpu.memory_space<vmem>>, vector<1x4x32xbf16>
    %413 = vector.shape_cast %412 : vector<1x4x32xbf16> to vector<4x32xbf16>
    %414 = vector.shape_cast %411 : vector<4x32xbf16> to vector<1x4x32xbf16>
    tpu.vector_store %arg6[%c7, %c0_86, %c0_87], %414 {strides = array<i32>} : memref<8x4x32xbf16, #tpu.memory_space<vmem>>, vector<1x4x32xbf16>,
    %c7_88 = arith.constant 7 : index
    %c0_89 = arith.constant 0 : index
    %c0_90 = arith.constant 0 : index
    %415 = vector.load %arg3[%c7_88, %c0_89, %c0_90] : memref<8x4x96xbf16, #tpu.memory_space<vmem>>, vector<1x4x96xbf16>
    %416 = vector.shape_cast %415 : vector<1x4x96xbf16> to vector<4x96xbf16>
    %417 = arith.extf %416 : vector<4x96xbf16> to vector<4x96xf32>
    %418 = arith.truncf %398 : vector<4x32xf32> to vector<4x32xbf16>
    %cst_91 = arith.constant dense<0.000000e+00> : vector<4x96xf32>
    %419 = tpu.matmul %418, %4, %cst_91 {dimension_numbers = #tpu.dot_dimension_numbers<[1], [0], [0], [1], [0, 0, 1, 1], [], []>} : vector<4x32xbf16>, vector<32x96xbf16>, vector<4x96xf32> -> vector<4x96xf32>
    %420 = vector.broadcast %5 : vector<1x96xf32> to vector<4x96xf32>
    %421 = arith.addf %419, %420 : vector<4x96xf32>
    %422 = vector.extract_strided_slice %417 {offsets = [0, 0], sizes = [4, 32], strides = [1, 1]} : vector<4x96xf32> to vector<4x32xf32>
    %423 = vector.extract_strided_slice %421 {offsets = [0, 0], sizes = [4, 32], strides = [1, 1]} : vector<4x96xf32> to vector<4x32xf32>
    %424 = arith.addf %422, %423 : vector<4x32xf32>
    %425 = arith.negf %424 : vector<4x32xf32>
    %426 = math.exp %425 : vector<4x32xf32>
    %cst_92 = arith.constant 1.000000e+00 : f32
    %427 = vector.broadcast %cst_92 : f32 to vector<4x32xf32>
    %428 = arith.addf %427, %426 : vector<4x32xf32>
    %429 = arith.divf %427, %428 : vector<4x32xf32>
    %430 = vector.extract_strided_slice %417 {offsets = [0, 32], sizes = [4, 32], strides = [1, 1]} : vector<4x96xf32> to vector<4x32xf32>
    %431 = vector.extract_strided_slice %421 {offsets = [0, 32], sizes = [4, 32], strides = [1, 1]} : vector<4x96xf32> to vector<4x32xf32>
    %432 = arith.addf %430, %431 : vector<4x32xf32>
    %433 = arith.negf %432 : vector<4x32xf32>
    %434 = math.exp %433 : vector<4x32xf32>
    %cst_93 = arith.constant 1.000000e+00 : f32
    %435 = vector.broadcast %cst_93 : f32 to vector<4x32xf32>
    %436 = arith.addf %435, %434 : vector<4x32xf32>
    %437 = arith.divf %435, %436 : vector<4x32xf32>
    %438 = vector.extract_strided_slice %417 {offsets = [0, 64], sizes = [4, 32], strides = [1, 1]} : vector<4x96xf32> to vector<4x32xf32>
    %439 = vector.extract_strided_slice %421 {offsets = [0, 64], sizes = [4, 32], strides = [1, 1]} : vector<4x96xf32> to vector<4x32xf32>
    %440 = arith.mulf %429, %439 : vector<4x32xf32>
    %441 = arith.addf %438, %440 : vector<4x32xf32>
    %442 = math.tanh %441 : vector<4x32xf32>
    %cst_94 = arith.constant 1.000000e+00 : f32
    %443 = vector.broadcast %cst_94 : f32 to vector<4x32xf32>
    %444 = arith.subf %443, %437 : vector<4x32xf32>
    %445 = arith.mulf %444, %442 : vector<4x32xf32>
    %446 = arith.mulf %437, %398 : vector<4x32xf32>
    %447 = arith.addf %445, %446 : vector<4x32xf32>
    %448 = vector.broadcast %404 : vector<4x1xf32> to vector<4x32xf32>
    %449 = arith.mulf %448, %447 : vector<4x32xf32>
    %cst_95 = arith.constant 1.000000e+00 : f32
    %450 = vector.broadcast %cst_95 : f32 to vector<4x1xf32>
    %451 = arith.subf %450, %404 : vector<4x1xf32>
    %452 = vector.broadcast %451 : vector<4x1xf32> to vector<4x32xf32>
    %453 = arith.mulf %452, %398 : vector<4x32xf32>
    %454 = arith.addf %449, %453 : vector<4x32xf32>
    %c0_96 = arith.constant 0 : index
    %c0_97 = arith.constant 0 : index
    %455 = vector.load %arg8[%c0_96, %c0_97] : memref<4x32xf32, #tpu.memory_space<vmem>>, vector<4x32xf32>
    tpu.vector_store %arg8[%c0_96, %c0_97], %454 {strides = array<i32>} : memref<4x32xf32, #tpu.memory_space<vmem>>, vector<4x32xf32>,
    %c0_i32_98 = arith.constant 0 : i32
    %456 = arith.cmpi eq, %arg1, %c0_i32_98 : i32
    %457 = arith.extui %456 : i1 to i32
    %c0_i32_99 = arith.constant 0 : i32
    %458 = arith.cmpi ne, %457, %c0_i32_99 : i32
    scf.if %458 {
      %c0_100 = arith.constant 0 : index
      %c0_101 = arith.constant 0 : index
      %459 = vector.load %arg7[%c0_100, %c0_101] : memref<4x32xf32, #tpu.memory_space<vmem>>, vector<4x32xf32>
      tpu.vector_store %arg7[%c0_100, %c0_101], %454 {strides = array<i32>} : memref<4x32xf32, #tpu.memory_space<vmem>>, vector<4x32xf32>,
    } else {
    }
    return
  }
  func.func @transform_0(%arg0: i32, %arg1: i32) -> (i32, i32) {
    %c0_i32 = arith.constant 0 : i32
    %c0_i32_0 = arith.constant 0 : i32
    return %arg0, %c0_i32 : i32, i32
  }
  func.func @transform_1(%arg0: i32, %arg1: i32) -> (i32, i32, i32) {
    %c0_i32 = arith.constant 0 : i32
    %c0_i32_0 = arith.constant 0 : i32
    return %arg1, %arg0, %c0_i32 : i32, i32, i32
  }
  func.func @transform_2(%arg0: i32, %arg1: i32) -> (i32, i32) {
    %c0_i32 = arith.constant 0 : i32
    %c0_i32_0 = arith.constant 0 : i32
    %c0_i32_1 = arith.constant 0 : i32
    return %c0_i32, %c0_i32_0 : i32, i32
  }
  func.func @transform_3(%arg0: i32, %arg1: i32) -> (i32, i32) {
    %c0_i32 = arith.constant 0 : i32
    %c0_i32_0 = arith.constant 0 : i32
    %c0_i32_1 = arith.constant 0 : i32
    return %c0_i32, %c0_i32_0 : i32, i32
  }
  func.func @transform_4(%arg0: i32, %arg1: i32) -> (i32, i32, i32) {
    %c0_i32 = arith.constant 0 : i32
    %c0_i32_0 = arith.constant 0 : i32
    return %arg1, %arg0, %c0_i32 : i32, i32, i32
  }
  func.func @transform_5(%arg0: i32, %arg1: i32) -> (i32, i32) {
    %c0_i32 = arith.constant 0 : i32
    %c0_i32_0 = arith.constant 0 : i32
    return %arg0, %c0_i32 : i32, i32
  }
}

</mosaic_0001>

<bundles_post_ra>
// kernel: tpu_custom_call.1
= control target key start
LH: loop header
LB: loop body
LE: loop exit
PB: predicated region body
PF: predicated region fallthrough
CT: control target
= control target key end

     0   :  { %11 = vsyncpa [#allocation4], 0  ;;  %s1611_s0 = inlined_call_operand.vmem [shape: s32[4,1], index: 0, kind: input, shape index: {}]   ;;  %s1612_s1 = inlined_call_operand.hbm [shape: bf16[8,4,96], index: 1, kind: input, shape index: {}]   ;;  %s1613_s2 = inlined_call_operand.hbm [shape: bf16[32,96], index: 2, kind: input, shape index: {}]   ;;  %s1614_s3 = inlined_call_operand.vmem [shape: f32[1,96], index: 3, kind: input, shape index: {}]   ;;  %s1615_s4 = inlined_call_operand.hbm [shape: bf16[8,4,32], index: 4, kind: output, shape index: {0}]   ;;  %s1616_s5 = inlined_call_operand.hbm [shape: f32[4,32], index: 5, kind: output, shape index: {1}]  }
   0x1   :  { %12 = vsyncpa [#allocation7], 0 }
   0x2   :  { %13 = vsyncpa [#allocation5], 0 }
   0x3   :  { %14 = vsyncpa [#allocation10], 0  ;;  %s1326_s18 = smov [#allocation3]  }
   0x4   :  { %s22_s19 = sshll.u32 %s1326_s18, 4  ;;  %s23_s19 = int_to_ptr.vmem [resolvable:$true] %s22_s19 }
   0x5   :  { %s1246_s20 = scalar_lea.vmem %s23_s19, 256  ;;  %p1251_p1 = scmp.lt.s32.totalorder %s23_s19, %s23_s19 }
   0x6   :  { %p1247_p0 = scmp.ne.s32.totalorder %s23_s19, %s1246_s20  ;;  %p1252_p2 = scmp.lt.s32.totalorder %s1246_s20, %s1246_s20 }
   0x8   :  { %p1253_p3 = por %p1252_p2, %p1251_p1 }
   0xa   :  { %p1254_p4 = pnand %p1253_p3, %p1247_p0 }
   0xc   :  { %1257 = shalt.err (!%p1254_p4)
}
   0xd   :  { %s1327_s21 = smov 32   ;;  %s1328_s22 = smov 2  }
   0xe   :  { %28 = dma.hbm_to_vmem [thread:$0]  %s1612_s1, 256, %s23_s19, [#allocation4], %s1327_s21, %s1327_s21, %s1328_s22  }
   0xf   :  { %s1329_s25 = smov [#allocation6]  }
  0x10   :  { %s34_s26 = sshll.u32 %s1329_s25, 4  ;;  %s35_s26 = int_to_ptr.vmem [resolvable:$true] %s34_s26 }
  0x11   :  { %s1266_s27 = scalar_lea.vmem %s35_s26, 256  ;;  %p1271_p6 = scmp.lt.s32.totalorder %s35_s26, %s35_s26 }
  0x12   :  { %p1267_p5 = scmp.ne.s32.totalorder %s35_s26, %s1266_s27  ;;  %p1272_p7 = scmp.lt.s32.totalorder %s1266_s27, %s1266_s27 }
  0x14   :  { %p1273_p8 = por %p1272_p7, %p1271_p6 }
  0x16   :  { %p1274_p9 = pnand %p1273_p8, %p1267_p5 }
  0x18   :  { %1277 = shalt.err (!%p1274_p9)
}
  0x19   :  { %s1330_s28 = smov 64   ;;  %s1331_s29 = smov 4  }
  0x1a   :  { %40 = dma.hbm_to_vmem [thread:$0]  %s1613_s2, 256, %s35_s26, [#allocation7], %s1330_s28, %s1330_s28, %s1331_s29  }
  0x1b   :  { %1318 = dma.done.wait [#allocation4], 256  }
  0x1c   :  { %1319 = vsyncadd [#allocation4], 4294967040 }
  0x1d   :  { %1320 = dma.done.wait [#allocation7], 256  }
  0x1e   :  { %1321 = vsyncadd [#allocation7], 4294967040  ;;  %vm54_vm0 = vcmask 257024   ;;  %v1332_v0 = vmov 0.0   ;;  %vm1333_vm1 = vmmov 0   ;;  %v1387_v1 = vld [vmem:[#allocation6 + $0x8] sm:$0xff]  }
  0x1f   :  { %1090 = vmatprep.subr.bf16.mxu0 %v1332_v0  ;;  %1094 = vmatprep.mubr.msk.bf16.mxu0 %vm1333_vm1, %v1332_v0  ;;  %55 = vst.msk [vmem:[#allocation2] sm:$0xf] %vm54_vm0, %v1332_v0  ;;  %v1390_v2 = vld [vmem:[#allocation6] sm:$0xff]   ;;  %vm101_vm2 = vcmask 261120   ;;  %v1413_v5 = vld [vmem:[%s1614_s3] ss:$0 sm:$0xff] }
  0x20   :  { %1098 = vmatprep.subr.bf16.mxu1 %v1332_v0  ;;  %1102 = vmatprep.mubr.msk.bf16.mxu1 %vm1333_vm1, %v1332_v0  ;;  %v80_v11 = vld [vmem:[#allocation3] sm:$0x3]  ;;  %v1421_v20 = vld [vmem:[%s1611_s0] sm:$0xf]  ;;  %v1334_v21 = vmov 0   ;;  %s1335_s8 = smov 96  }
  0x21   :  { %1091 = vmatpush3.bf16.msra.mxu0 %v1387_v1  ;;  %1099 = vmatpush3.bf16.msra.mxu1 %v1387_v1  ;;  %v81_v12 = vunpack.c.l.bf16 %v80_v11  ;;  %vm1015_vm3 = vcmp.gt.s32.totalorder %v1421_v20, 0  ;;  %v211_v45 = vld [vmem:[#allocation3 + $0x2] sm:$0x3]  ;;  %vm1024_vm4 = vcmp.gt.s32.totalorder %v1421_v20, 1  ;;  %vm1030_vm5 = vcmp.gt.s32.totalorder %v1421_v20, 2  ;;  %s1336_s0 = smov [#allocation8]  }
  0x22   :  { %1092 = vmatprep.subr.bf16.mxu0 %v1332_v0  ;;  %1100 = vmatprep.subr.bf16.mxu1 %v1332_v0  ;;  %v1016_v22 = vsel %vm1015_vm3, 1.0, %v1332_v0  ;;  %v212_v46 = vunpack.c.l.bf16 %v211_v45  ;;  %v1025_v54 = vsel %vm1024_vm4, 1.0, %v1332_v0  ;;  %vm1036_vm6 = vcmp.gt.s32.totalorder %v1421_v20, 3  ;;  %s988_s9 = sshll.u32 %s1336_s0, 4  ;;  %s989_s9 = int_to_ptr.vmem [resolvable:$true] %s988_s9 }
  0x23   :  { %1167 = vset.pattern.permute.xlu1 %v1334_v21  ;;  %1166 = vset.pattern.permute.xlu0 %v1334_v21  ;;  %v185_v26 = vsub.f32 1.0, %v1016_v22  ;;  %v297_v55 = vsub.f32 1.0, %v1025_v54  ;;  %vm1042_vm7 = vcmp.gt.s32.totalorder %v1421_v20, 4  ;;  %vm1048_vm8 = vcmp.gt.s32.totalorder %v1421_v20, 5  ;;  %s1278_s10 = scalar_lea.vmem %s989_s9, 256  ;;  %p1283_p11 = scmp.lt.s32.totalorder %s989_s9, %s989_s9 }
  0x24   :  { %vm1054_vm9 = vcmp.gt.s32.totalorder %v1421_v20, 6  ;;  %vm1032_vm10 = vcmp.ge.s32.totalorder %v1421_v20, 2  ;;  %vm1038_vm11 = vcmp.ge.s32.totalorder %v1421_v20, 3  ;;  %vm1056_vm12 = vcmp.ge.s32.totalorder %v1421_v20, 6  ;;  %p1279_p10 = scmp.ne.s32.totalorder %s989_s9, %s1278_s10  ;;  %p1284_p12 = scmp.lt.s32.totalorder %s1278_s10, %s1278_s10 }
  0x25   :  { %1093 = vmatpush3.bf16.msra.mxu0 %v1390_v2  ;;  %1101 = vmatpush3.bf16.msra.mxu1 %v1390_v2  ;;  %vm1062_vm13 = vcmp.ge.s32.totalorder %v1421_v20, 7  ;;  %vm1060_vm14 = vcmp.gt.s32.totalorder %v1421_v20, 7  ;;  %vm1017_vm15 = vcmp.ge.s32.totalorder %v1421_v20, 0  ;;  %vm1050_vm3 = vcmp.ge.s32.totalorder %v1421_v20, 5 }
  0x26   :  { %v1392_v3 = vld [vmem:[#allocation2] sm:$0xf]  ;;  %1106 = vmatprep.subr.bf16.mxu0 %v1332_v0  ;;  %1114 = vmatprep.subr.bf16.mxu1 %v1332_v0  ;;  %vm78_vm4 = vcmask 254976   ;;  %p1285_p13 = por %p1284_p12, %p1283_p11 }
  0x27   :  { %v82_v4 = vpack.c.bf16 %v1392_v3, %v1392_v3 }
  0x28   :  { %p1286_p0 = pnand %p1285_p13, %p1279_p10 }
  0x29   :  { %1095 = vmatmul.mubr.msk.bf16.vlgmr.msra.gmra.mxu0 %vm101_vm2, %v82_v4 }
  0x2a   :  { %1107 = vmatpush3.bf16.msra.mxu0 %v1387_v1  ;;  %1110 = vmatprep.mubr.msk.bf16.mxu0 %vm1333_vm1, %v1332_v0 }
  0x2b   :  { %1108 = vmatprep.subr.bf16.mxu0 %v1332_v0 }
  0x2e   :  { %1109 = vmatpush3.bf16.msra.mxu0 %v1390_v2 }
  0x2f   :  { %1122 = vmatprep.subr.bf16.mxu0 %v1332_v0 }
  0xe9   :  { %v139_v6 = vpop.f32.mrf.mxu0 }
  0xea   :  { %v140_v7 = vadd.f32 %v1413_v5, %v139_v6 }
  0xeb   :  { %v1096_v8 = vpop.f32.mrf.mxu0 }
  0xec   :  { %153 = vrot.lane.b32.xlu0 %v140_v7, %s1330_s28  ;;  %v145_v13 = vadd.f32 %v140_v7, %v81_v12 }
  0xed   :  { %v142_v9 = vpop.f32.mrf.mxu0 }
  0xee   :  { %v1023_v14 = vmul.f32 -1.442695, %v145_v13 }
  0xef   :  { %v1097_v10 = vpop.f32.mrf.mxu0 }
  0xf0   :  { %1190 = vpow2.f32 %v1023_v14 }
  0xfd   :  { %v1191_v15 = vpop.eup %1190 }
  0xfe   :  { %v149_v16 = vadd.f32 1.0, %v1191_v15 }
 0x100   :  { %1192 = vrcp.f32 %v149_v16 }
 0x10d   :  { %v1193_v17 = vpop.eup %1192 }
 0x10e   :  { %v163_v28 = vsub.f32 1.0, %v1193_v17 }
 0x15e   :  { %v154_v18 = vpop.permute.xlu0 %153 }
 0x15f   :  { %v156_v19 = vmul.f32 %v1193_v17, %v154_v18  ;;  %v323_v18 = vld [vmem:[#allocation3 + $0x4] sm:$0x3] }
 0x161   :  { %158 = vrot.lane.b32.xlu0 %v156_v19, %s1330_s28  ;;  %v324_v19 = vunpack.c.l.bf16 %v323_v18 }
 0x165   :  { %177 = vperm.xlu0 %1166, %v1016_v22  }
 0x1d3   :  { %v159_v23 = vpop.permute.xlu0 %158 }
 0x1d4   :  { %v161_v24 = vadd.f32 %v159_v23, %v81_v12 }
 0x1d6   :  { %1194 = vtanh.f32 %v161_v24 }
 0x1e0   :  { %v178_v34 = vpop.permute.xlu0 %177 }
 0x1e3   :  { %v1195_v25 = vpop.eup %1194 }
 0x1e4   :  { %165 = vrot.lane.b32.xlu1 %v1195_v25, %s1335_s8 }
 0x1e8   :  { %170 = vrot.lane.b32.xlu1 %v1392_v3, %s1327_s21 }
 0x1ec   :  { %188 = vperm.xlu1 %1167, %v185_v26  }
 0x256   :  { %v166_v27 = vpop.permute.xlu1 %165 }
 0x257   :  { %v168_v30 = vmul.f32 %v166_v27, %v163_v28  ;;  %v1031_v28 = vsel %vm1030_vm5, 1.0, %v1332_v0 }
 0x25a   :  { %v171_v29 = vpop.permute.xlu1 %170 }
 0x25b   :  { %v173_v31 = vmul.f32 %v1193_v17, %v171_v29  ;;  %v409_v29 = vsub.f32 1.0, %v1031_v28 }
 0x25d   :  { %v174_v32 = vadd.f32 %v173_v31, %v168_v30 }
 0x25f   :  { %181 = vrot.lane.b32.xlu1 %v174_v32, %s1335_s8 }
 0x267   :  { %v189_v33 = vpop.permute.xlu1 %188 }
 0x268   :  { %v191_v36 = vmul.f32 %v189_v33, %v1392_v3 }
 0x2d1   :  { %v182_v35 = vpop.permute.xlu1 %181 }
 0x2d2   :  { %v184_v37 = vmul.f32 %v182_v35, %v178_v34 }
 0x2d4   :  { %v1430_v38 = vadd.f32 %v191_v36, %v184_v37 }
 0x2d6   :  { %v213_v39 = vpack.c.bf16 %v1430_v38, %v1430_v38 }
 0x2d8   :  { %1103 = vmatmul.mubr.msk.bf16.vlgmr.msra.gmra.mxu1 %vm101_vm2, %v213_v39 }
 0x2d9   :  { %1115 = vmatpush3.bf16.msra.mxu1 %v1387_v1  ;;  %1118 = vmatprep.mubr.msk.bf16.mxu1 %vm1333_vm1, %v1332_v0 }
 0x2da   :  { %1116 = vmatprep.subr.bf16.mxu1 %v1332_v0 }
 0x2dd   :  { %1117 = vmatpush3.bf16.msra.mxu1 %v1390_v2 }
 0x2de   :  { %1130 = vmatprep.subr.bf16.mxu1 %v1332_v0 }
 0x398   :  { %v251_v40 = vpop.f32.mrf.mxu1 }
 0x399   :  { %v252_v41 = vadd.f32 %v1413_v5, %v251_v40 }
 0x39a   :  { %v1104_v42 = vpop.f32.mrf.mxu1 }
 0x39b   :  { %265 = vrot.lane.b32.xlu0 %v252_v41, %s1330_s28  ;;  %v257_v47 = vadd.f32 %v252_v41, %v212_v46 }
 0x39c   :  { %v254_v43 = vpop.f32.mrf.mxu1 }
 0x39d   :  { %v1029_v48 = vmul.f32 -1.442695, %v257_v47 }
 0x39e   :  { %v1105_v44 = vpop.f32.mrf.mxu1 }
 0x39f   :  { %1196 = vpow2.f32 %v1029_v48 }
 0x3ac   :  { %v1197_v49 = vpop.eup %1196 }
 0x3ad   :  { %v261_v50 = vadd.f32 1.0, %v1197_v49 }
 0x3af   :  { %1198 = vrcp.f32 %v261_v50 }
 0x3bc   :  { %v1199_v51 = vpop.eup %1198 }
 0x3bd   :  { %v275_v60 = vsub.f32 1.0, %v1199_v51 }
 0x40d   :  { %v266_v52 = vpop.permute.xlu0 %265 }
 0x40e   :  { %v268_v53 = vmul.f32 %v1199_v51, %v266_v52  ;;  %v435_v52 = vld [vmem:[#allocation3 + $0x6] sm:$0x3] }
 0x410   :  { %270 = vrot.lane.b32.xlu1 %v268_v53, %s1330_s28  ;;  %v436_v53 = vunpack.c.l.bf16 %v435_v52 }
 0x414   :  { %282 = vrot.lane.b32.xlu1 %v1430_v38, %s1327_s21 }
 0x418   :  { %300 = vperm.xlu1 %1167, %v297_v55  }
 0x482   :  { %v271_v56 = vpop.permute.xlu1 %270 }
 0x483   :  { %v273_v57 = vadd.f32 %v271_v56, %v212_v46 }
 0x485   :  { %1200 = vtanh.f32 %v273_v57 }
 0x486   :  { %v283_v59 = vpop.permute.xlu1 %282 }
 0x487   :  { %v285_v62 = vmul.f32 %v1199_v51, %v283_v59 }
 0x492   :  { %v1201_v58 = vpop.eup %1200 }
 0x493   :  { %277 = vrot.lane.b32.xlu0 %v1201_v58, %s1335_s8  ;;  %v301_v7 = vpop.permute.xlu1 %300 }
 0x494   :  { %v303_v9 = vmul.f32 %v301_v7, %v1430_v38 }
 0x497   :  { %289 = vperm.xlu0 %1166, %v1025_v54  }
 0x505   :  { %v278_v61 = vpop.permute.xlu0 %277 }
 0x506   :  { %v280_v63 = vmul.f32 %v278_v61, %v275_v60  ;;  %v1037_v61 = vsel %vm1036_vm6, 1.0, %v1332_v0 }
 0x508   :  { %v286_v4 = vadd.f32 %v285_v62, %v280_v63  ;;  %v521_v62 = vsub.f32 1.0, %v1037_v61 }
 0x50a   :  { %293 = vrot.lane.b32.xlu0 %v286_v4, %s1335_s8 }
 0x512   :  { %v290_v6 = vpop.permute.xlu0 %289 }
 0x57c   :  { %v294_v8 = vpop.permute.xlu0 %293 }
 0x57d   :  { %v296_v10 = vmul.f32 %v294_v8, %v290_v6 }
 0x57f   :  { %v1451_v11 = vadd.f32 %v303_v9, %v296_v10 }
 0x581   :  { %v325_v12 = vpack.c.bf16 %v1451_v11, %v1451_v11 }
 0x583   :  { %1111 = vmatmul.mubr.msk.bf16.vlgmr.msra.gmra.mxu0 %vm101_vm2, %v325_v12 }
 0x584   :  { %1123 = vmatpush3.bf16.msra.mxu0 %v1387_v1  ;;  %1126 = vmatprep.mubr.msk.bf16.mxu0 %vm1333_vm1, %v1332_v0 }
 0x585   :  { %1124 = vmatprep.subr.bf16.mxu0 %v1332_v0 }
 0x588   :  { %1125 = vmatpush3.bf16.msra.mxu0 %v1390_v2 }
 0x589   :  { %1138 = vmatprep.subr.bf16.mxu0 %v1332_v0 }
 0x643   :  { %v363_v13 = vpop.f32.mrf.mxu0 }
 0x644   :  { %v364_v14 = vadd.f32 %v1413_v5, %v363_v13 }
 0x645   :  { %v1112_v15 = vpop.f32.mrf.mxu0 }
 0x646   :  { %377 = vrot.lane.b32.xlu1 %v364_v14, %s1330_s28  ;;  %v369_v21 = vadd.f32 %v364_v14, %v324_v19 }
 0x647   :  { %v366_v16 = vpop.f32.mrf.mxu0 }
 0x648   :  { %v1035_v22 = vmul.f32 -1.442695, %v369_v21 }
 0x649   :  { %v1113_v17 = vpop.f32.mrf.mxu0 }
 0x64a   :  { %1202 = vpow2.f32 %v1035_v22 }
 0x657   :  { %v1203_v23 = vpop.eup %1202 }
 0x658   :  { %v373_v24 = vadd.f32 1.0, %v1203_v23 }
 0x65a   :  { %1204 = vrcp.f32 %v373_v24 }
 0x667   :  { %v1205_v25 = vpop.eup %1204 }
 0x668   :  { %v387_v34 = vsub.f32 1.0, %v1205_v25 }
 0x6b8   :  { %v378_v26 = vpop.permute.xlu1 %377 }
 0x6b9   :  { %v380_v27 = vmul.f32 %v1205_v25, %v378_v26 }
 0x6bb   :  { %382 = vrot.lane.b32.xlu0 %v380_v27, %s1330_s28  ;;  %v547_v27 = vld [vmem:[#allocation3 + $0x8] sm:$0x3] }
 0x6bf   :  { %394 = vrot.lane.b32.xlu0 %v1451_v11, %s1327_s21 }
 0x6c3   :  { %412 = vperm.xlu0 %1166, %v409_v29  }
 0x72d   :  { %v383_v30 = vpop.permute.xlu0 %382 }
 0x72e   :  { %v385_v31 = vadd.f32 %v383_v30, %v324_v19 }
 0x730   :  { %1206 = vtanh.f32 %v385_v31 }
 0x731   :  { %v395_v33 = vpop.permute.xlu0 %394 }
 0x732   :  { %v397_v36 = vmul.f32 %v1205_v25, %v395_v33 }
 0x73d   :  { %v1207_v32 = vpop.eup %1206 }
 0x73e   :  { %389 = vrot.lane.b32.xlu1 %v1207_v32, %s1335_s8  ;;  %v413_v41 = vpop.permute.xlu0 %412 }
 0x73f   :  { %v415_v43 = vmul.f32 %v413_v41, %v1451_v11 }
 0x742   :  { %401 = vperm.xlu1 %1167, %v1031_v28   ;;  %v548_v28 = vunpack.c.l.bf16 %v547_v27 }
 0x7b0   :  { %v390_v35 = vpop.permute.xlu1 %389 }
 0x7b1   :  { %v392_v37 = vmul.f32 %v390_v35, %v387_v34 }
 0x7b3   :  { %v398_v39 = vadd.f32 %v397_v36, %v392_v37  ;;  %v1043_v36 = vsel %vm1042_vm7, 1.0, %v1332_v0 }
 0x7b4   :  { %v633_v37 = vsub.f32 1.0, %v1043_v36 }
 0x7b5   :  { %405 = vrot.lane.b32.xlu1 %v398_v39, %s1335_s8 }
 0x7bd   :  { %v402_v40 = vpop.permute.xlu1 %401 }
 0x827   :  { %v406_v42 = vpop.permute.xlu1 %405 }
 0x828   :  { %v408_v44 = vmul.f32 %v406_v42, %v402_v40 }
 0x82a   :  { %v1472_v45 = vadd.f32 %v415_v43, %v408_v44 }
 0x82c   :  { %v437_v46 = vpack.c.bf16 %v1472_v45, %v1472_v45 }
 0x82e   :  { %1119 = vmatmul.mubr.msk.bf16.vlgmr.msra.gmra.mxu1 %vm101_vm2, %v437_v46 }
 0x82f   :  { %1131 = vmatpush3.bf16.msra.mxu1 %v1387_v1  ;;  %1134 = vmatprep.mubr.msk.bf16.mxu1 %vm1333_vm1, %v1332_v0 }
 0x830   :  { %1132 = vmatprep.subr.bf16.mxu1 %v1332_v0 }
 0x833   :  { %1133 = vmatpush3.bf16.msra.mxu1 %v1390_v2 }
 0x834   :  { %1146 = vmatprep.subr.bf16.mxu1 %v1332_v0 }
 0x8ee   :  { %v475_v47 = vpop.f32.mrf.mxu1 }
 0x8ef   :  { %v476_v48 = vadd.f32 %v1413_v5, %v475_v47 }
 0x8f0   :  { %v1120_v49 = vpop.f32.mrf.mxu1 }
 0x8f1   :  { %489 = vrot.lane.b32.xlu0 %v476_v48, %s1330_s28  ;;  %v481_v54 = vadd.f32 %v476_v48, %v436_v53 }
 0x8f2   :  { %v478_v50 = vpop.f32.mrf.mxu1 }
 0x8f3   :  { %v1041_v55 = vmul.f32 -1.442695, %v481_v54 }
 0x8f4   :  { %v1121_v51 = vpop.f32.mrf.mxu1 }
 0x8f5   :  { %1208 = vpow2.f32 %v1041_v55 }
 0x902   :  { %v1209_v56 = vpop.eup %1208 }
 0x903   :  { %v485_v57 = vadd.f32 1.0, %v1209_v56 }
 0x905   :  { %1210 = vrcp.f32 %v485_v57 }
 0x912   :  { %v1211_v58 = vpop.eup %1210 }
 0x913   :  { %v499_v8 = vsub.f32 1.0, %v1211_v58 }
 0x963   :  { %v490_v59 = vpop.permute.xlu0 %489 }
 0x964   :  { %v492_v60 = vmul.f32 %v1211_v58, %v490_v59 }
 0x966   :  { %494 = vrot.lane.b32.xlu1 %v492_v60, %s1330_s28 }
 0x96a   :  { %506 = vrot.lane.b32.xlu1 %v1472_v45, %s1327_s21 }
 0x96e   :  { %524 = vperm.xlu1 %1167, %v521_v62  }
 0x9d8   :  { %v495_v63 = vpop.permute.xlu1 %494 }
 0x9d9   :  { %v497_v4 = vadd.f32 %v495_v63, %v436_v53 }
 0x9db   :  { %1212 = vtanh.f32 %v497_v4 }
 0x9dc   :  { %v507_v7 = vpop.permute.xlu1 %506 }
 0x9dd   :  { %v509_v10 = vmul.f32 %v1211_v58, %v507_v7 }
 0x9e8   :  { %v1213_v6 = vpop.eup %1212 }
 0x9e9   :  { %501 = vrot.lane.b32.xlu0 %v1213_v6, %s1335_s8  ;;  %v525_v15 = vpop.permute.xlu1 %524 }
 0x9ea   :  { %v527_v17 = vmul.f32 %v525_v15, %v1472_v45 }
 0x9ed   :  { %513 = vperm.xlu0 %1166, %v1037_v61   ;;  %v659_v61 = vld [vmem:[#allocation3 + $0xa] sm:$0x3] }
 0x9ee   :  { %v660_v62 = vunpack.c.l.bf16 %v659_v61 }
 0xa5b   :  { %v502_v9 = vpop.permute.xlu0 %501 }
 0xa5c   :  { %v504_v12 = vmul.f32 %v502_v9, %v499_v8 }
 0xa5e   :  { %v510_v13 = vadd.f32 %v509_v10, %v504_v12 }
 0xa60   :  { %517 = vrot.lane.b32.xlu0 %v510_v13, %s1335_s8 }
 0xa68   :  { %v514_v14 = vpop.permute.xlu0 %513 }
 0xad2   :  { %v518_v16 = vpop.permute.xlu0 %517 }
 0xad3   :  { %v520_v18 = vmul.f32 %v518_v16, %v514_v14 }
 0xad5   :  { %v1493_v19 = vadd.f32 %v527_v17, %v520_v18 }
 0xad7   :  { %v549_v21 = vpack.c.bf16 %v1493_v19, %v1493_v19 }
 0xad9   :  { %1127 = vmatmul.mubr.msk.bf16.vlgmr.msra.gmra.mxu0 %vm101_vm2, %v549_v21 }
 0xada   :  { %1139 = vmatpush3.bf16.msra.mxu0 %v1387_v1  ;;  %1142 = vmatprep.mubr.msk.bf16.mxu0 %vm1333_vm1, %v1332_v0 }
 0xadb   :  { %1140 = vmatprep.subr.bf16.mxu0 %v1332_v0 }
 0xade   :  { %1141 = vmatpush3.bf16.msra.mxu0 %v1390_v2 }
 0xb99   :  { %v587_v22 = vpop.f32.mrf.mxu0 }
 0xb9a   :  { %v588_v23 = vadd.f32 %v1413_v5, %v587_v22 }
 0xb9b   :  { %v1128_v24 = vpop.f32.mrf.mxu0 }
 0xb9c   :  { %601 = vrot.lane.b32.xlu1 %v588_v23, %s1330_s28  ;;  %v593_v29 = vadd.f32 %v588_v23, %v548_v28 }
 0xb9d   :  { %v590_v25 = vpop.f32.mrf.mxu0 }
 0xb9e   :  { %v1047_v30 = vmul.f32 -1.442695, %v593_v29 }
 0xb9f   :  { %v1129_v26 = vpop.f32.mrf.mxu0 }
 0xba0   :  { %1214 = vpow2.f32 %v1047_v30 }
 0xbad   :  { %v1215_v31 = vpop.eup %1214 }
 0xbae   :  { %v597_v32 = vadd.f32 1.0, %v1215_v31 }
 0xbb0   :  { %1216 = vrcp.f32 %v597_v32 }
 0xbbd   :  { %v1217_v33 = vpop.eup %1216 }
 0xbbe   :  { %v611_v43 = vsub.f32 1.0, %v1217_v33 }
 0xc0e   :  { %v602_v34 = vpop.permute.xlu1 %601 }
 0xc0f   :  { %v604_v35 = vmul.f32 %v1217_v33, %v602_v34 }
 0xc11   :  { %606 = vrot.lane.b32.xlu0 %v604_v35, %s1330_s28  ;;  %v771_v35 = vld [vmem:[#allocation3 + $0xc] sm:$0x3] }
 0xc15   :  { %618 = vrot.lane.b32.xlu0 %v1493_v19, %s1327_s21 }
 0xc19   :  { %636 = vperm.xlu0 %1166, %v633_v37  }
 0xc83   :  { %v607_v39 = vpop.permute.xlu0 %606 }
 0xc84   :  { %v609_v40 = vadd.f32 %v607_v39, %v548_v28 }
 0xc86   :  { %1218 = vtanh.f32 %v609_v40 }
 0xc87   :  { %v619_v42 = vpop.permute.xlu0 %618 }
 0xc88   :  { %v621_v46 = vmul.f32 %v1217_v33, %v619_v42 }
 0xc93   :  { %v1219_v41 = vpop.eup %1218 }
 0xc94   :  { %613 = vrot.lane.b32.xlu1 %v1219_v41, %s1335_s8  ;;  %v637_v50 = vpop.permute.xlu0 %636 }
 0xc95   :  { %v639_v52 = vmul.f32 %v637_v50, %v1493_v19 }
 0xc98   :  { %625 = vperm.xlu1 %1167, %v1043_v36   ;;  %v772_v36 = vunpack.c.l.bf16 %v771_v35 }
 0xd06   :  { %v614_v44 = vpop.permute.xlu1 %613 }
 0xd07   :  { %v616_v47 = vmul.f32 %v614_v44, %v611_v43 }
 0xd09   :  { %v622_v48 = vadd.f32 %v621_v46, %v616_v47  ;;  %v1055_v46 = vsel %vm1054_vm9, 1.0, %v1332_v0 }
 0xd0a   :  { %v857_v47 = vsub.f32 1.0, %v1055_v46 }
 0xd0b   :  { %629 = vrot.lane.b32.xlu1 %v622_v48, %s1335_s8 }
 0xd13   :  { %v626_v49 = vpop.permute.xlu1 %625 }
 0xd7d   :  { %v630_v51 = vpop.permute.xlu1 %629 }
 0xd7e   :  { %v632_v53 = vmul.f32 %v630_v51, %v626_v49 }
 0xd80   :  { %v1513_v54 = vadd.f32 %v639_v52, %v632_v53 }
 0xd82   :  { %v661_v55 = vpack.c.bf16 %v1513_v54, %v1513_v54 }
 0xd84   :  { %1135 = vmatmul.mubr.msk.bf16.vlgmr.msra.gmra.mxu1 %vm101_vm2, %v661_v55 }
 0xd85   :  { %1147 = vmatpush3.bf16.msra.mxu1 %v1387_v1  ;;  %1150 = vmatprep.mubr.msk.bf16.mxu1 %vm1333_vm1, %v1332_v0  ;;  %vm1026_vm1 = vcmp.ge.s32.totalorder %v1421_v20, 1 }
 0xd86   :  { %1148 = vmatprep.subr.bf16.mxu1 %v1332_v0 }
 0xd89   :  { %1149 = vmatpush3.bf16.msra.mxu1 %v1390_v2  ;;  %v1049_v2 = vsel %vm1048_vm8, 1.0, %v1332_v0 }
 0xd8a   :  { %v745_v10 = vsub.f32 1.0, %v1049_v2 }
 0xe44   :  { %v699_v56 = vpop.f32.mrf.mxu1 }
 0xe45   :  { %v700_v57 = vadd.f32 %v1413_v5, %v699_v56 }
 0xe46   :  { %v1136_v58 = vpop.f32.mrf.mxu1 }
 0xe47   :  { %713 = vrot.lane.b32.xlu0 %v700_v57, %s1330_s28  ;;  %v705_v63 = vadd.f32 %v700_v57, %v660_v62 }
 0xe48   :  { %v702_v59 = vpop.f32.mrf.mxu1 }
 0xe49   :  { %v1053_v4 = vmul.f32 -1.442695, %v705_v63 }
 0xe4a   :  { %v1137_v60 = vpop.f32.mrf.mxu1 }
 0xe4b   :  { %1220 = vpow2.f32 %v1053_v4 }
 0xe58   :  { %v1221_v1 = vpop.eup %1220 }
 0xe59   :  { %v709_v6 = vadd.f32 1.0, %v1221_v1 }
 0xe5b   :  { %1222 = vrcp.f32 %v709_v6 }
 0xe68   :  { %v1223_v7 = vpop.eup %1222 }
 0xe69   :  { %v723_v16 = vsub.f32 1.0, %v1223_v7 }
 0xeb9   :  { %v714_v8 = vpop.permute.xlu0 %713 }
 0xeba   :  { %v716_v9 = vmul.f32 %v1223_v7, %v714_v8 }
 0xebc   :  { %718 = vrot.lane.b32.xlu1 %v716_v9, %s1330_s28 }
 0xec0   :  { %730 = vrot.lane.b32.xlu1 %v1513_v54, %s1327_s21 }
 0xec4   :  { %748 = vperm.xlu1 %1167, %v745_v10  }
 0xf2e   :  { %v719_v12 = vpop.permute.xlu1 %718 }
 0xf2f   :  { %v721_v13 = vadd.f32 %v719_v12, %v660_v62 }
 0xf31   :  { %1224 = vtanh.f32 %v721_v13 }
 0xf32   :  { %v731_v15 = vpop.permute.xlu1 %730 }
 0xf33   :  { %v733_v18 = vmul.f32 %v1223_v7, %v731_v15 }
 0xf3e   :  { %v1225_v14 = vpop.eup %1224 }
 0xf3f   :  { %725 = vrot.lane.b32.xlu0 %v1225_v14, %s1335_s8  ;;  %v749_v24 = vpop.permute.xlu1 %748 }
 0xf40   :  { %v751_v26 = vmul.f32 %v749_v24, %v1513_v54  ;;  %v1063_v24 = vsel %vm1062_vm13, 1.0, %v1332_v0 }
 0xf43   :  { %737 = vperm.xlu0 %1166, %v1049_v2   ;;  %v883_v2 = vld [vmem:[#allocation3 + $0xe] sm:$0x3] }
 0xf44   :  { %v884_v10 = vunpack.c.l.bf16 %v883_v2 }
 0xfb1   :  { %v726_v17 = vpop.permute.xlu0 %725 }
 0xfb2   :  { %v728_v21 = vmul.f32 %v726_v17, %v723_v16 }
 0xfb4   :  { %v734_v22 = vadd.f32 %v733_v18, %v728_v21  ;;  %v1039_v21 = vsel %vm1038_vm11, 1.0, %v1332_v0 }
 0xfb6   :  { %741 = vrot.lane.b32.xlu0 %v734_v22, %s1335_s8 }
 0xfbe   :  { %v738_v23 = vpop.permute.xlu0 %737 }
0x1028   :  { %v742_v25 = vpop.permute.xlu0 %741 }
0x1029   :  { %v744_v27 = vmul.f32 %v742_v25, %v738_v23  ;;  %v1057_v23 = vsel %vm1056_vm12, 1.0, %v1332_v0 }
0x102a   :  { %v1183_v25 = vpack.i.bf16 %v1063_v24, %v1057_v23 }
0x102b   :  { %v1533_v28 = vadd.f32 %v751_v26, %v744_v27  ;;  %v1061_v26 = vsel %vm1060_vm14, 1.0, %v1332_v0 }
0x102c   :  { %v969_v27 = vsub.f32 1.0, %v1061_v26 }
0x102d   :  { %v773_v29 = vpack.c.bf16 %v1533_v28, %v1533_v28 }
0x102f   :  { %1143 = vmatmul.mubr.msk.bf16.vlgmr.msra.gmra.mxu0 %vm101_vm2, %v773_v29 }
0x10ef   :  { %v811_v30 = vpop.f32.mrf.mxu0 }
0x10f0   :  { %v812_v31 = vadd.f32 %v1413_v5, %v811_v30 }
0x10f1   :  { %v1144_v32 = vpop.f32.mrf.mxu0 }
0x10f2   :  { %825 = vrot.lane.b32.xlu1 %v812_v31, %s1330_s28  ;;  %v817_v37 = vadd.f32 %v812_v31, %v772_v36  ;;  %v1018_v32 = vsel %vm1017_vm15, 1.0, %v1332_v0 }
0x10f3   :  { %v814_v33 = vpop.f32.mrf.mxu0 }
0x10f4   :  { %v1059_v39 = vmul.f32 -1.442695, %v817_v37  ;;  %v1027_v33 = vsel %vm1026_vm1, 1.0, %v1332_v0 }
0x10f5   :  { %v1145_v34 = vpop.f32.mrf.mxu0 }
0x10f6   :  { %1226 = vpow2.f32 %v1059_v39 }
0x1103   :  { %v1227_v40 = vpop.eup %1226 }
0x1104   :  { %v821_v41 = vadd.f32 1.0, %v1227_v40 }
0x1106   :  { %1228 = vrcp.f32 %v821_v41  ;;  %v1051_v41 = vsel %vm1050_vm3, 1.0, %v1332_v0 }
0x1113   :  { %v1229_v42 = vpop.eup %1228 }
0x1114   :  { %v835_v52 = vsub.f32 1.0, %v1229_v42 }
0x1164   :  { %v826_v43 = vpop.permute.xlu1 %825 }
0x1165   :  { %v828_v44 = vmul.f32 %v1229_v42, %v826_v43 }
0x1167   :  { %830 = vrot.lane.b32.xlu0 %v828_v44, %s1330_s28 }
0x116b   :  { %842 = vrot.lane.b32.xlu0 %v1533_v28, %s1327_s21 }
0x116f   :  { %860 = vperm.xlu0 %1166, %v857_v47  }
0x11d9   :  { %v831_v48 = vpop.permute.xlu0 %830 }
0x11da   :  { %v833_v49 = vadd.f32 %v831_v48, %v772_v36  ;;  %v1168_v36 = vpack.i.bf16 %v1027_v33, %v1018_v32 }
0x11dc   :  { %1230 = vtanh.f32 %v833_v49 }
0x11dd   :  { %v843_v51 = vpop.permute.xlu0 %842 }
0x11de   :  { %v845_v55 = vmul.f32 %v1229_v42, %v843_v51 }
0x11e9   :  { %v1231_v50 = vpop.eup %1230 }
0x11ea   :  { %837 = vrot.lane.b32.xlu1 %v1231_v50, %s1335_s8  ;;  %v861_v59 = vpop.permute.xlu0 %860 }
0x11eb   :  { %v863_v61 = vmul.f32 %v861_v59, %v1533_v28 }
0x11ee   :  { %849 = vperm.xlu1 %1167, %v1055_v46  }
0x125c   :  { %v838_v53 = vpop.permute.xlu1 %837 }
0x125d   :  { %v840_v56 = vmul.f32 %v838_v53, %v835_v52 }
0x125f   :  { %v846_v57 = vadd.f32 %v845_v55, %v840_v56 }
0x1261   :  { %853 = vrot.lane.b32.xlu1 %v846_v57, %s1335_s8 }
0x1269   :  { %v850_v58 = vpop.permute.xlu1 %849 }
0x12d3   :  { %v854_v60 = vpop.permute.xlu1 %853 }
0x12d4   :  { %v856_v62 = vmul.f32 %v854_v60, %v850_v58 }
0x12d6   :  { %v1548_v63 = vadd.f32 %v863_v61, %v856_v62 }
0x12d8   :  { %v885_v4 = vpack.c.bf16 %v1548_v63, %v1548_v63 }
0x12da   :  { %1151 = vmatmul.mubr.msk.bf16.vlgmr.msra.gmra.mxu1 %vm101_vm2, %v885_v4  ;;  %vm1044_vm2 = vcmp.ge.s32.totalorder %v1421_v20, 4 }
0x12db   :  { %v1045_v40 = vsel %vm1044_vm2, 1.0, %v1332_v0 }
0x12dc   :  { %v1178_v46 = vpack.i.bf16 %v1051_v41, %v1045_v40 }
0x139a   :  { %v923_v1 = vpop.f32.mrf.mxu1 }
0x139b   :  { %v924_v6 = vadd.f32 %v1413_v5, %v923_v1  ;;  %v1033_v5 = vsel %vm1032_vm10, 1.0, %v1332_v0 }
0x139c   :  { %v1152_v7 = vpop.f32.mrf.mxu1  ;;  %v1173_v22 = vpack.i.bf16 %v1039_v21, %v1033_v5 }
0x139d   :  { %937 = vrot.lane.b32.xlu0 %v924_v6, %s1330_s28  ;;  %v929_v12 = vadd.f32 %v924_v6, %v884_v10 }
0x139e   :  { %v926_v8 = vpop.f32.mrf.mxu1 }
0x139f   :  { %v1065_v13 = vmul.f32 -1.442695, %v929_v12 }
0x13a0   :  { %v1153_v9 = vpop.f32.mrf.mxu1 }
0x13a1   :  { %1232 = vpow2.f32 %v1065_v13 }
0x13ae   :  { %v1233_v14 = vpop.eup %1232 }
0x13af   :  { %v933_v15 = vadd.f32 1.0, %v1233_v14 }
0x13b1   :  { %1234 = vrcp.f32 %v933_v15 }
0x13be   :  { %v1555_v16 = vpop.eup %1234 }
0x140f   :  { %v938_v17 = vpop.permute.xlu0 %937 }
0x1410   :  { %v940_v18 = vmul.f32 %v1555_v16, %v938_v17 }
0x1412   :  { %942 = vrot.lane.b32.xlu1 %v940_v18, %s1330_s28 }
0x1416   :  { %954 = vrot.lane.b32.xlu1 %v1548_v63, %s1327_s21 }
0x141a   :  { %1174 = vperm.xlu1 %1167, %v1173_v22  }
0x141e   :  { %1184 = vperm.xlu1 %1167, %v1183_v25  }
0x1422   :  { %972 = vperm.xlu1 %1167, %v969_v27  }
0x1484   :  { %v943_v29 = vpop.permute.xlu1 %942 }
0x1485   :  { %v945_v30 = vadd.f32 %v943_v29, %v884_v10 }
0x1487   :  { %1236 = vtanh.f32 %v945_v30 }
0x1488   :  { %v955_v31 = vpop.permute.xlu1 %954 }
0x1489   :  { %v957_v53 = vmul.f32 %v1555_v16, %v955_v31 }
0x1494   :  { %v1237_v34 = vpop.eup %1236 }
0x1495   :  { %949 = vrot.lane.b32.xlu0 %v1237_v34, %s1335_s8  ;;  %v1175_v35 = vpop.permute.xlu1 %1174 }
0x1496   :  { %v1177_v37 = vunpack.i.h.bf16 %v1175_v35  ;;  %v1176_v39 = vunpack.i.l.bf16 %v1175_v35 }
0x1498   :  { %v430_v42 = vmul.f32 %v1177_v37, %v1472_v45  ;;  %v318_v43 = vmul.f32 %v1176_v39, %v1451_v11  ;;  %v947_v11 = vsub.f32 1.0, %v1555_v16 }
0x1499   :  { %1169 = vperm.xlu0 %1166, %v1168_v36   ;;  %v1185_v44 = vpop.permute.xlu1 %1184 }
0x149a   :  { %v431_v20 = vpack.c.bf16 %v430_v42, %v430_v42  ;;  %v319_v47 = vpack.c.bf16 %v318_v43, %v318_v43  ;;  %v1187_v48 = vunpack.i.h.bf16 %v1185_v44  ;;  %v1186_v49 = vunpack.i.l.bf16 %v1185_v44 }
0x149c   :  { %433 = vst.msk [vmem:[#allocation8 + $0x6] sm:$0x3] %vm78_vm4, %v431_v20  ;;  %321 = vst.msk [vmem:[#allocation8 + $0x4] sm:$0x3] %vm78_vm4, %v319_v47  ;;  %v878_v50 = vmul.f32 %v1187_v48, %v1548_v63  ;;  %v766_v0 = vmul.f32 %v1186_v49, %v1533_v28 }
0x149d   :  { %1179 = vperm.xlu0 %1166, %v1178_v46  }
0x149e   :  { %v879_v45 = vpack.c.bf16 %v878_v50, %v878_v50  ;;  %v767_v51 = vpack.c.bf16 %v766_v0, %v766_v0 }
0x14a0   :  { %881 = vst.msk [vmem:[#allocation8 + $0xe] sm:$0x3] %vm78_vm4, %v879_v45  ;;  %769 = vst.msk [vmem:[#allocation8 + $0xc] sm:$0x3] %vm78_vm4, %v767_v51 }
0x14a1   :  { %961 = vperm.xlu0 %1166, %v1061_v26  }
0x1507   :  { %v950_v52 = vpop.permute.xlu0 %949 }
0x1508   :  { %v952_v55 = vmul.f32 %v950_v52, %v947_v11 }
0x150a   :  { %v958_v56 = vadd.f32 %v957_v53, %v952_v55 }
0x150c   :  { %965 = vrot.lane.b32.xlu0 %v958_v56, %s1335_s8 }
0x1514   :  { %v1170_v57 = vpop.permute.xlu0 %1169 }
0x1515   :  { %v1172_v58 = vunpack.i.h.bf16 %v1170_v57  ;;  %v1171_v28 = vunpack.i.l.bf16 %v1170_v57 }
0x1517   :  { %v206_v59 = vmul.f32 %v1172_v58, %v1430_v38  ;;  %v76_v60 = vmul.f32 %v1171_v28, %v1392_v3 }
0x1518   :  { %v1180_v61 = vpop.permute.xlu0 %1179 }
0x1519   :  { %v207_v62 = vpack.c.bf16 %v206_v59, %v206_v59  ;;  %v77_v4 = vpack.c.bf16 %v76_v60, %v76_v60  ;;  %v1182_v1 = vunpack.i.h.bf16 %v1180_v61  ;;  %v1181_v6 = vunpack.i.l.bf16 %v1180_v61 }
0x151b   :  { %209 = vst.msk [vmem:[#allocation8 + $0x2] sm:$0x3] %vm78_vm4, %v207_v62  ;;  %79 = vst.msk [vmem:[#allocation8] sm:$0x3] %vm78_vm4, %v77_v4  ;;  %v654_v7 = vmul.f32 %v1182_v1, %v1513_v54  ;;  %v542_v8 = vmul.f32 %v1181_v6, %v1493_v19 }
0x151d   :  { %v655_v9 = vpack.c.bf16 %v654_v7, %v654_v7  ;;  %v543_v2 = vpack.c.bf16 %v542_v8, %v542_v8 }
0x151f   :  { %657 = vst.msk [vmem:[#allocation8 + $0xa] sm:$0x3] %vm78_vm4, %v655_v9  ;;  %545 = vst.msk [vmem:[#allocation8 + $0x8] sm:$0x3] %vm78_vm4, %v543_v2 }
0x1520   :  { %1289 = shalt.err (!%p1286_p0)
}
0x1521   :  { %994 = dma.vmem_to_hbm [thread:$0]  %s989_s9, 256, %s1615_s4, [#allocation5], %s1327_s21, %s1327_s21, %s1328_s22   ;;  %v962_v3 = vpop.permute.xlu0 %961  ;;  %v973_v38 = vpop.permute.xlu1 %972 }
0x1522   :  { %s1337_s13 = smov [#allocation9]   ;;  %v975_v54 = vmul.f32 %v973_v38, %v1548_v63 }
0x1523   :  { %s1001_s14 = sshll.u32 %s1337_s13, 4  ;;  %s1002_s14 = int_to_ptr.vmem [resolvable:$true] %s1001_s14 }
0x1524   :  { %s1298_s15 = scalar_lea.vmem %s1002_s14, 64  ;;  %p1303_p2 = scmp.lt.s32.totalorder %s1002_s14, %s1002_s14 }
0x1525   :  { %p1299_p1 = scmp.ne.s32.totalorder %s1002_s14, %s1298_s15  ;;  %p1304_p3 = scmp.lt.s32.totalorder %s1298_s15, %s1298_s15 }
0x1527   :  { %p1305_p4 = por %p1304_p3, %p1303_p2 }
0x1529   :  { %p1306_p5 = pnand %p1305_p4, %p1299_p1 }
0x157e   :  { %v966_v19 = vpop.permute.xlu0 %965 }
0x157f   :  { %v968_v10 = vmul.f32 %v966_v19, %v962_v3 }
0x1581   :  { %v976_v12 = vadd.f32 %v975_v54, %v968_v10 }
0x1583   :  { %978 = vst.msk [vmem:[#allocation2] sm:$0xf] %vm54_vm0, %v976_v12  ;;  %982 = vst.msk [vmem:[#allocation9] sm:$0xf] %vm54_vm0, %v976_v12 }
0x1584   :  { %1309 = shalt.err (!%p1306_p5)
}
0x1585   :  { %1004 = dma.vmem_to_hbm [thread:$0]  %s1002_s14, 64, %s1616_s5, [#allocation10]  }
0x1586   :  { %1322 = dma.done.wait [#allocation5], 256  }
0x1587   :  { %1323 = vsyncadd [#allocation5], 4294967040 }
0x1588   :  { %1324 = dma.done.wait [#allocation10], 64  }
0x1589   :  { %1325 = vsyncadd [#allocation10], 4294967232 }
0x158a   :  { %1011 = vsyncpa [#allocation4], 1 }
0x158b   :  { %1012 = vsyncpa [#allocation7], 1 }
0x158c   :  { %1013 = vsyncpa [#allocation5], 1 }
0x158d   :  { %1014 = vsyncpa [#allocation10], 1 }

</bundles_post_ra>
